<compile_context>
chip_gen: v5e
topology: v5e:2x2
jax: 0.10.0
libtpu: 0.0.40
codegen_flags: <defaults>
</compile_context>

<pallas_src>
import functools

import jax
import jax.numpy as jnp
from jax.experimental import pallas as pl
from jax.experimental.pallas import tpu as pltpu


# ---------------------------------------------------------------------------
# Pallas kernel: tiled matmul + folded-BN scale/bias + optional residual/ReLU
# ---------------------------------------------------------------------------

def _mm_kernel(a_ref, b_ref, s_ref, c_ref, *rest, relu, has_res):
    if has_res:
        r_ref, o_ref, acc_ref = rest
    else:
        o_ref, acc_ref = rest

    @pl.when(pl.program_id(2) == 0)
    def _():
        acc_ref[...] = jnp.zeros_like(acc_ref)

    acc_ref[...] += jnp.dot(a_ref[...], b_ref[...],
                            preferred_element_type=jnp.float32)

    @pl.when(pl.program_id(2) == pl.num_programs(2) - 1)
    def _():
        y = acc_ref[...] * s_ref[...] + c_ref[...]
        if has_res:
            y = y + r_ref[...].astype(jnp.float32)
        if relu:
            y = jnp.maximum(y, 0.0)
        o_ref[...] = y.astype(o_ref.dtype)


def _round_up(x, m):
    return ((x + m - 1) // m) * m


def matmul_bias_act(a, b, scale=None, bias=None, residual=None, *, relu=False):
    """out = act((a @ b) * scale + bias [+ residual]); bf16 in/out, f32 acc."""
    M, K = a.shape
    K2, N = b.shape
    assert K == K2

    a = a.astype(jnp.bfloat16)
    b = b.astype(jnp.bfloat16)

    if scale is None:
        scale = jnp.ones((N,), jnp.float32)
    if bias is None:
        bias = jnp.zeros((N,), jnp.float32)
    s2 = scale.astype(jnp.float32).reshape(1, N)
    c2 = bias.astype(jnp.float32).reshape(1, N)

    # ---- tile selection (no padding on the common path) -------------------
    tm = M if M <= 512 else 512                       # prefer growing M blocks

    if N >= 512 and N % 512 == 0:
        tn = 512
    elif N % 256 == 0:
        tn = 256
    elif N % 128 == 0:
        tn = 128
    elif N <= 1024:
        tn = N                                        # full-extent block
    else:
        tn = 128                                      # trailing block masked

    if K <= 2048:
        tk, Kp = K, K                                 # full-extent K, 1 k-step
    else:
        tk = next((c for c in (2048, 1024, 512, 256, 128) if K % c == 0), None)
        if tk is None:                                # rare fallback: pad K
            tk = 512
            Kp = _round_up(K, tk)
            a = jnp.pad(a, ((0, 0), (0, Kp - K)))
            b = jnp.pad(b, ((0, Kp - K), (0, 0)))
        else:
            Kp = K

    grid = (pl.cdiv(M, tm), pl.cdiv(N, tn), Kp // tk)

    has_res = residual is not None
    operands = [a, b, s2, c2]
    in_specs = [
        pl.BlockSpec((tm, tk), lambda i, j, k: (i, k)),
        pl.BlockSpec((tk, tn), lambda i, j, k: (k, j)),
        pl.BlockSpec((1, tn), lambda i, j, k: (0, j)),
        pl.BlockSpec((1, tn), lambda i, j, k: (0, j)),
    ]
    if has_res:
        operands.append(residual.reshape(M, N).astype(jnp.bfloat16))
        in_specs.append(pl.BlockSpec((tm, tn), lambda i, j, k: (i, j)))

    flops = 2 * M * N * K
    bytes_accessed = (2 * (M * K + K * N + M * N) + 8 * N
                      + (2 * M * N if has_res else 0))

    kernel = functools.partial(_mm_kernel, relu=relu, has_res=has_res)
    out = pl.pallas_call(
        kernel,
        out_shape=jax.ShapeDtypeStruct((M, N), jnp.bfloat16),
        grid_spec=pltpu.PrefetchScalarGridSpec(
            num_scalar_prefetch=0,
            grid=grid,
            in_specs=in_specs,
            out_specs=pl.BlockSpec((tm, tn), lambda i, j, k: (i, j)),
            scratch_shapes=[pltpu.VMEM((tm, tn), jnp.float32)],
        ),
        compiler_params=pltpu.CompilerParams(
            dimension_semantics=("parallel", "parallel", "arbitrary"),
            vmem_limit_bytes=48 * 1024 * 1024,
        ),
        cost_estimate=pl.CostEstimate(
            flops=flops, transcendentals=0, bytes_accessed=bytes_accessed),
    )(*operands)
    return out


# ---------------------------------------------------------------------------
# Conv / pool / resize built on the Pallas matmul (glue = reshapes & slicing)
# ---------------------------------------------------------------------------

def _im2col(x, kh, kw, stride, dilation, padding):
    """x: NHWC bf16 -> patches (N*oh*ow, kh*kw*C) ordered (kh, kw, cin)."""
    N, H, W, C = x.shape
    oh = (H + 2 * padding - dilation * (kh - 1) - 1) // stride + 1
    ow = (W + 2 * padding - dilation * (kw - 1) - 1) // stride + 1
    xp = jnp.pad(x, ((0, 0), (padding, padding), (padding, padding), (0, 0)))
    cols = []
    for i in range(kh):
        for j in range(kw):
            sl = jax.lax.slice(
                xp,
                (0, i * dilation, j * dilation, 0),
                (N, i * dilation + (oh - 1) * stride + 1,
                 j * dilation + (ow - 1) * stride + 1, C),
                (1, stride, stride, 1))
            cols.append(sl)
    patches = jnp.concatenate(cols, axis=-1)
    return patches.reshape(N * oh * ow, kh * kw * C), oh, ow
# TODO(synk): 3x3 im2col still materializes a 9x patch copy (in bf16); a true
# implicit-GEMM conv (taps folded into the k grid axis) would remove it.


def conv2d_bn_act(x, w, scale, bias, stride=1, dilation=1, padding=0,
                  relu=False, residual=None):
    """Conv (HWIO weights) + folded-BN scale/bias (+residual) via Pallas matmul."""
    kh, kw, cin, cout = w.shape
    N, H, W, C = x.shape
    if kh == 1 and kw == 1 and padding == 0:
        if stride != 1:
            x = x[:, ::stride, ::stride, :]
        oh, ow = x.shape[1], x.shape[2]
        patches = x.reshape(N * oh * ow, C)
    else:
        patches, oh, ow = _im2col(x, kh, kw, stride, dilation, padding)
    wm = w.reshape(kh * kw * cin, cout)
    y = matmul_bias_act(patches, wm, scale, bias, residual=residual, relu=relu)
    return y.reshape(N, oh, ow, cout)


def maxpool_3x3_s2_p1(x):
    # Small one-off op; patch-wise elementwise max (glue).
    N, H, W, C = x.shape
    oh = (H + 2 - 3) // 2 + 1
    ow = (W + 2 - 3) // 2 + 1
    xp = jnp.pad(x, ((0, 0), (1, 1), (1, 1), (0, 0)),
                 constant_values=-jnp.inf)
    out = None
    for i in range(3):
        for j in range(3):
            sl = jax.lax.slice(
                xp, (0, i, j, 0),
                (N, i + (oh - 1) * 2 + 1, j + (ow - 1) * 2 + 1, C),
                (1, 2, 2, 1))
            out = sl if out is None else jnp.maximum(out, sl)
    return out


def _interp_matrix(out_size, in_size):
    """PyTorch bilinear (align_corners=False) 1-D interpolation matrix."""
    scale = in_size / out_size
    dst = jnp.arange(out_size, dtype=jnp.float32)
    src = jnp.maximum((dst + 0.5) * scale - 0.5, 0.0)
    x0 = jnp.minimum(jnp.floor(src).astype(jnp.int32), in_size - 1)
    x1 = jnp.minimum(x0 + 1, in_size - 1)
    w1 = src - x0.astype(jnp.float32)
    w0 = 1.0 - w1
    rows = jnp.arange(out_size)
    m = jnp.zeros((out_size, in_size), jnp.float32)
    m = m.at[rows, x0].add(w0)
    m = m.at[rows, x1].add(w1)
    return m


def bilinear_resize(x, out_h, out_w):
    """F.interpolate(mode='bilinear', align_corners=False) as two un-padded
    separable Pallas matmuls (full-extent K blocks, no MXU zero-padding)."""
    # TODO(synk): a lane-dense VPU gather+lerp kernel would avoid the two
    # transposes; at the 2-sparse-per-row sizes here the matmul form is cheap.
    N, H, W, C = x.shape
    mh = _interp_matrix(out_h, H)
    mw = _interp_matrix(out_w, W)
    t = jnp.transpose(x, (1, 0, 2, 3)).reshape(H, N * W * C)
    y = matmul_bias_act(mh, t).reshape(out_h, N, W, C)
    t2 = jnp.transpose(y, (2, 0, 1, 3)).reshape(W, out_h * N * C)
    y2 = matmul_bias_act(mw, t2).reshape(out_w, out_h, N, C)
    return jnp.transpose(y2, (2, 1, 0, 3))


# ---------------------------------------------------------------------------
# Deterministic parameter construction
# ---------------------------------------------------------------------------

class KeyGen:
    def __init__(self, key):
        self.key = key

    def __call__(self):
        self.key, sub = jax.random.split(self.key)
        return sub


def conv_bn_params(kg, kh, kw, cin, cout, eps=1e-5):
    fan_in = kh * kw * cin
    w = (jax.random.normal(kg(), (kh, kw, cin, cout), jnp.float32)
         * (2.0 / fan_in) ** 0.5).astype(jnp.bfloat16)
    gamma = jax.random.uniform(kg(), (cout,), jnp.float32, 0.5, 1.5)
    beta = jax.random.normal(kg(), (cout,), jnp.float32) * 0.1
    mean = jax.random.normal(kg(), (cout,), jnp.float32) * 0.1
    var = jax.random.uniform(kg(), (cout,), jnp.float32, 0.5, 1.5)
    scale = gamma * jax.lax.rsqrt(var + eps)   # eval-mode BN folded into epilogue
    bias = beta - mean * scale
    return {'w': w, 'scale': scale, 'bias': bias}


def conv_bias_params(kg, kh, kw, cin, cout):
    fan_in = kh * kw * cin
    w = (jax.random.normal(kg(), (kh, kw, cin, cout), jnp.float32)
         * (2.0 / fan_in) ** 0.5).astype(jnp.bfloat16)
    b = jax.random.normal(kg(), (cout,), jnp.float32) * 0.01
    return {'w': w, 'scale': jnp.ones((cout,), jnp.float32), 'bias': b}


def bottleneck_params(kg, cin, planes, downsample):
    p = {'c1': conv_bn_params(kg, 1, 1, cin, planes),
         'c2': conv_bn_params(kg, 3, 3, planes, planes),
         'c3': conv_bn_params(kg, 1, 1, planes, planes * 4)}
    if downsample:
        p['down'] = conv_bn_params(kg, 1, 1, cin, planes * 4)
    return p


# TODO(synk): external resnet101_atrous depth is (3, 4, 23, 3); truncated to
# (1, 1, 2, 3) bottleneck blocks per stage for this synthetic kernel demo.
BLOCK_COUNTS = (1, 1, 2, 3)


def make_backbone_params(kg):
    params = {'stem': conv_bn_params(kg, 7, 7, 3, 64)}
    cin = 64
    # os=16: layer4 keeps stride 1 and uses multi-grid dilations (2,4,8).
    cfgs = [
        (64,  BLOCK_COUNTS[0], 1, [1] * BLOCK_COUNTS[0]),
        (128, BLOCK_COUNTS[1], 2, [1] * BLOCK_COUNTS[1]),
        (256, BLOCK_COUNTS[2], 2, [1] * BLOCK_COUNTS[2]),
        (512, BLOCK_COUNTS[3], 1, [2, 4, 8][:BLOCK_COUNTS[3]]),
    ]
    layers = []
    for planes, nblocks, stride, dils in cfgs:
        blocks = []
        for b in range(nblocks):
            s = stride if b == 0 else 1
            down = (b == 0 and (s != 1 or cin != planes * 4))
            blocks.append({'params': bottleneck_params(kg, cin, planes, down),
                           'stride': s, 'dilation': dils[b]})
            cin = planes * 4
        layers.append(blocks)
    params['layers'] = layers
    return params


def make_head_params(kg, cin, num_classes):
    return {'c1': conv_bn_params(kg, 3, 3, cin, 256),
            'c2': conv_bias_params(kg, 1, 1, 256, num_classes)}


# ---------------------------------------------------------------------------
# Forward pass
# ---------------------------------------------------------------------------

def _conv_block(x, p, stride=1, dilation=1, padding=0, relu=False):
    return conv2d_bn_act(x, p['w'], p['scale'], p['bias'],
                         stride=stride, dilation=dilation, padding=padding,
                         relu=relu)


def bottleneck_forward(x, blk):
    p, stride, dil = blk['params'], blk['stride'], blk['dilation']
    identity = _conv_block(x, p['down'], stride=stride) if 'down' in p else x
    out = _conv_block(x, p['c1'], relu=True)
    out = _conv_block(out, p['c2'], stride=stride, dilation=dil, padding=dil,
                      relu=True)
    # residual add + ReLU fused into the c3 matmul epilogue
    out = conv2d_bn_act(out, p['c3']['w'], p['c3']['scale'], p['c3']['bias'],
                        relu=True, residual=identity)
    return out


def backbone_forward(params, x):
    x = _conv_block(x, params['stem'], stride=2, padding=3, relu=True)
    x = maxpool_3x3_s2_p1(x)
    layer_outs = []
    for blocks in params['layers']:
        for blk in blocks:
            x = bottleneck_forward(x, blk)
        layer_outs.append(x)
    return x, layer_outs   # layers = [layer1, layer2, layer3, layer4]


def head_forward(x, p):
    x = _conv_block(x, p['c1'], padding=1, relu=True)
    # TODO(synk): nn.Dropout(0.1) in aux_classifier is an identity at inference.
    x = _conv_block(x, p['c2'])
    return x


def resnext101_mg_forward(params, x_nchw):
    # NCHW f32 (PyTorch) -> NHWC bf16 (kernel layout)
    x = jnp.transpose(x_nchw, (0, 2, 3, 1)).astype(jnp.bfloat16)
    feat4, layers = backbone_forward(params['backbone'], x)

    H, W = x_nchw.shape[2], x_nchw.shape[3]
    out = head_forward(feat4, params['classifier'])
    aux = head_forward(layers[-2], params['aux'])   # layer3 (1024 ch) features
    out = bilinear_resize(out, H, W)
    aux = bilinear_resize(aux, H, W)

    return {
        'out': jnp.transpose(out, (0, 3, 1, 2)).astype(jnp.float32),
        'aux': jnp.transpose(aux, (0, 3, 1, 2)).astype(jnp.float32),
        'layers': [jnp.transpose(l, (0, 3, 1, 2)).astype(jnp.float32)
                   for l in layers],
    }


# ---------------------------------------------------------------------------

if __name__ == "__main__":
    num_classes = 21
    batch, cin, hw = 2, 3, 64

    x = jax.random.normal(jax.random.PRNGKey(0), (batch, cin, hw, hw),
                          jnp.float32)

    kg = KeyGen(jax.random.PRNGKey(1))
    params = {
        'backbone': make_backbone_params(kg),
        'classifier': make_head_params(kg, 2048, num_classes),
        'aux': make_head_params(kg, 1024, num_classes),
    }

    result = resnext101_mg_forward(params, x)
    jax.block_until_ready(result['out'])
    jax.block_until_ready(result['aux'])

    assert result['out'].shape == (batch, num_classes, hw, hw)
    assert result['aux'].shape == (batch, num_classes, hw, hw)
    assert result['layers'][-1].shape[1] == 2048
    assert result['layers'][-2].shape[1] == 1024
    assert bool(jnp.isfinite(result['out']).all())
    assert bool(jnp.isfinite(result['aux']).all())

    print("KERNEL_OK")
</pallas_src>

<mosaic_0001>
module attributes {stable_mosaic.version = 11 : i64} {
  func.func @_mm_kernel(%arg0: i32, %arg1: i32, %arg2: i32, %arg3: memref<512x147xbf16, #tpu.memory_space<vmem>>, %arg4: memref<147x64xbf16, #tpu.memory_space<vmem>>, %arg5: memref<1x64xf32, #tpu.memory_space<vmem>>, %arg6: memref<1x64xf32, #tpu.memory_space<vmem>>, %arg7: memref<512x64xbf16, #tpu.memory_space<vmem>>, %arg8: memref<512x64xf32, #tpu.memory_space<vmem>>) attributes {dimension_semantics = [#tpu.dimension_semantics<parallel>, #tpu.dimension_semantics<parallel>, #tpu.dimension_semantics<arbitrary>], iteration_bounds = array<i64: 4, 1, 1>, scalar_prefetch = 0 : i64, scratch_operands = 1 : i64, tpu.core_type = #tpu.core_type<tc>, window_params = [{transform_indices = @transform_0, window_bounds = array<i64: 512, 147>}, {transform_indices = @transform_1, window_bounds = array<i64: 147, 64>}, {transform_indices = @transform_2, window_bounds = array<i64: 1, 64>}, {transform_indices = @transform_3, window_bounds = array<i64: 1, 64>}, {transform_indices = @transform_4, window_bounds = array<i64: 512, 64>}]} {
    %c0_i32 = arith.constant 0 : i32
    %0 = arith.cmpi eq, %arg2, %c0_i32 : i32
    %1 = arith.extui %0 : i1 to i32
    %c0_i32_0 = arith.constant 0 : i32
    %2 = arith.cmpi ne, %1, %c0_i32_0 : i32
    scf.if %2 {
      %cst_10 = arith.constant 0.000000e+00 : f32
      %12 = vector.broadcast %cst_10 : f32 to vector<512x64xf32>
      %c0_11 = arith.constant 0 : index
      %c0_12 = arith.constant 0 : index
      %13 = vector.load %arg8[%c0_11, %c0_12] : memref<512x64xf32, #tpu.memory_space<vmem>>, vector<512x64xf32>
      tpu.vector_store %arg8[%c0_11, %c0_12], %12 {strides = array<i32>} : memref<512x64xf32, #tpu.memory_space<vmem>>, vector<512x64xf32>,
    } else {
    }
    %c0 = arith.constant 0 : index
    %c0_1 = arith.constant 0 : index
    %3 = vector.load %arg8[%c0, %c0_1] : memref<512x64xf32, #tpu.memory_space<vmem>>, vector<512x64xf32>
    %c0_2 = arith.constant 0 : index
    %c0_3 = arith.constant 0 : index
    %4 = vector.load %arg3[%c0_2, %c0_3] : memref<512x147xbf16, #tpu.memory_space<vmem>>, vector<512x147xbf16>
    %c0_4 = arith.constant 0 : index
    %c0_5 = arith.constant 0 : index
    %5 = vector.load %arg4[%c0_4, %c0_5] : memref<147x64xbf16, #tpu.memory_space<vmem>>, vector<147x64xbf16>
    %cst = arith.constant dense<0.000000e+00> : vector<512x64xf32>
    %6 = tpu.matmul %4, %5, %cst {dimension_numbers = #tpu.dot_dimension_numbers<[1], [0], [0], [1], [0, 0, 1, 1], [], []>} : vector<512x147xbf16>, vector<147x64xbf16>, vector<512x64xf32> -> vector<512x64xf32>
    %7 = arith.addf %3, %6 : vector<512x64xf32>
    %c0_6 = arith.constant 0 : index
    %c0_7 = arith.constant 0 : index
    %8 = vector.load %arg8[%c0_6, %c0_7] : memref<512x64xf32, #tpu.memory_space<vmem>>, vector<512x64xf32>
    tpu.vector_store %arg8[%c0_6, %c0_7], %7 {strides = array<i32>} : memref<512x64xf32, #tpu.memory_space<vmem>>, vector<512x64xf32>,
    %c0_i32_8 = arith.constant 0 : i32
    %9 = arith.cmpi eq, %arg2, %c0_i32_8 : i32
    %10 = arith.extui %9 : i1 to i32
    %c0_i32_9 = arith.constant 0 : i32
    %11 = arith.cmpi ne, %10, %c0_i32_9 : i32
    scf.if %11 {
      %c0_10 = arith.constant 0 : index
      %c0_11 = arith.constant 0 : index
      %12 = vector.load %arg8[%c0_10, %c0_11] : memref<512x64xf32, #tpu.memory_space<vmem>>, vector<512x64xf32>
      %c0_12 = arith.constant 0 : index
      %c0_13 = arith.constant 0 : index
      %13 = vector.load %arg5[%c0_12, %c0_13] : memref<1x64xf32, #tpu.memory_space<vmem>>, vector<1x64xf32>
      %14 = vector.broadcast %13 : vector<1x64xf32> to vector<512x64xf32>
      %15 = arith.mulf %12, %14 : vector<512x64xf32>
      %c0_14 = arith.constant 0 : index
      %c0_15 = arith.constant 0 : index
      %16 = vector.load %arg6[%c0_14, %c0_15] : memref<1x64xf32, #tpu.memory_space<vmem>>, vector<1x64xf32>
      %17 = vector.broadcast %16 : vector<1x64xf32> to vector<512x64xf32>
      %18 = arith.addf %15, %17 : vector<512x64xf32>
      %cst_16 = arith.constant 0.000000e+00 : f32
      %19 = vector.broadcast %cst_16 : f32 to vector<512x64xf32>
      %20 = arith.maximumf %18, %19 : vector<512x64xf32>
      %21 = arith.truncf %20 : vector<512x64xf32> to vector<512x64xbf16>
      %c0_17 = arith.constant 0 : index
      %c0_18 = arith.constant 0 : index
      %22 = vector.load %arg7[%c0_17, %c0_18] : memref<512x64xbf16, #tpu.memory_space<vmem>>, vector<512x64xbf16>
      tpu.vector_store %arg7[%c0_17, %c0_18], %21 {strides = array<i32>} : memref<512x64xbf16, #tpu.memory_space<vmem>>, vector<512x64xbf16>,
    } else {
    }
    return
  }
  func.func @transform_0(%arg0: i32, %arg1: i32, %arg2: i32) -> (i32, i32) {
    %c0_i32 = arith.constant 0 : i32
    return %arg0, %arg2 : i32, i32
  }
  func.func @transform_1(%arg0: i32, %arg1: i32, %arg2: i32) -> (i32, i32) {
    %c0_i32 = arith.constant 0 : i32
    return %arg2, %arg1 : i32, i32
  }
  func.func @transform_2(%arg0: i32, %arg1: i32, %arg2: i32) -> (i32, i32) {
    %c0_i32 = arith.constant 0 : i32
    %c0_i32_0 = arith.constant 0 : i32
    return %c0_i32, %arg1 : i32, i32
  }
  func.func @transform_3(%arg0: i32, %arg1: i32, %arg2: i32) -> (i32, i32) {
    %c0_i32 = arith.constant 0 : i32
    %c0_i32_0 = arith.constant 0 : i32
    return %c0_i32, %arg1 : i32, i32
  }
  func.func @transform_4(%arg0: i32, %arg1: i32, %arg2: i32) -> (i32, i32) {
    %c0_i32 = arith.constant 0 : i32
    return %arg0, %arg1 : i32, i32
  }
}

</mosaic_0001>

<bundles_post_ra>
// kernel: tpu_custom_call.1
= control target key start
LH: loop header
LB: loop body
LE: loop exit
PB: predicated region body
PF: predicated region fallthrough
CT: control target
= control target key end

     0   :  { %s2467_s15 = smov 0   ;;  %s2469_s16 = smov 0   ;;  %s3304_s0 = inlined_call_operand.vmem [shape: bf16[2048,147], index: 0, kind: input, shape index: {}]   ;;  %s3305_s1 = inlined_call_operand.vmem [shape: bf16[147,64], index: 1, kind: input, shape index: {}]   ;;  %s3306_s2 = inlined_call_operand.vmem [shape: f32[1,64], index: 2, kind: input, shape index: {}]   ;;  %s3307_s3 = inlined_call_operand.vmem [shape: f32[1,64], index: 3, kind: input, shape index: {}]   ;;  %s3308_s4 = inlined_call_operand.vmem [shape: bf16[2048,64], index: 4, kind: output, shape index: {}]  }
   0x1   :  { %s2471_s17 = smov 0  }
   0x2 LB: > { %s33_s18 = sadd.s32 1, %s2434_s16  ;;  %p1970_p0 = scmp.ge.s32.totalorder %s2438_s17, 1  ;;  %s2438_s17 = sphi %s2471_s17, %s14_s17   ;;  %s2434_s16 = sphi %s2469_s16, %s3310_s16   ;;  %s2430_s15 = sphi %s2467_s15, %s3309_s15  }
   0x3   : > { %p35_p1 = scmp.ge.s32.totalorder %s33_s18, 4  ;;  %p224_p2 = scmp.lt.s32.totalorder %s2438_s17, 5 }
   0x5   : > { %s3312_s18 = smov (%p35_p1, %s33_s18), 0  ;;  %p225_p3 = pnand %p1970_p0, %p224_p2 }
   0x6   : > { %s1971_s23 = sshll.u32 (!%p225_p3), %s2430_s15, 6 }
   0x7   : > { %228 = sbr.rel (%p225_p3) target bundleno = 446 (0x1be), region = 36  ;;  %p274_p4 = scmp.lt.s32.totalorder (!%p225_p3), %s1971_s23, 255 }
   0xc   : > { %v2374_v0 = vld [vmem:[%s3305_s1 + $0x38] sm:$0xff]  ;;  %v524_v1 = vld [vmem:[%s3305_s1 + $0x48] sm:$0x3]  ;;  %vm967_vm0 = vcmask 1040384   ;;  %vm968_vm1 = vcmask 1041408   ;;  %v2373_v3 = vld [vmem:[%s3305_s1 + $0x30] sm:$0xff] }
   0xd   : > { %v850_v2 = vunpack.c.l.b16 %v524_v1  ;;  %974 = vmatpush.bf16.msra.mxu0 %v2374_v0  ;;  %2376 = vmatpush.bf16.msra.mxu2 %v2374_v0  ;;  %v2440_v4 = vmov 65535   ;;  %s3314_s23 = smov (!%p274_p4, %s1971_s23), 255  ;;  %v2372_v9 = vld [vmem:[%s3305_s1 + $0x28] sm:$0xff]  ;;  %v2375_v10 = vld [vmem:[%s3305_s1 + $0x40] sm:$0xff]  ;;  %vm870_vm2 = vcmask 154624   ;;  %v2370_v18 = vld [vmem:[%s3305_s1 + $0x18] sm:$0xff] }
   0xe   : > { %v969_v5 = vsel %vm967_vm0, 4294967295, %v2440_v4  ;;  %s2302_s28 = sshll.u32 %s3314_s23, 3  ;;  %v2371_v14 = vld [vmem:[%s3305_s1 + $0x20] sm:$0xff]  ;;  %v2369_v19 = vld [vmem:[%s3305_s1 + $0x10] sm:$0xff]  ;;  %v2368_v20 = vld [vmem:[%s3305_s1 + $0x8] sm:$0xff]  ;;  %vm313_vm3 = vcmask 523264  }
   0xf   : > { %v860_v6 = vpack.c.b16 %v850_v2, %v850_v2  ;;  %v970_v7 = vsel %vm968_vm1, %v969_v5, 0  ;;  %s2506_s7 = scalar_lea.vmem %s3304_s0, %s2302_s28  ;;  %v2367_v26 = vld [vmem:[%s3305_s1] sm:$0xff]  ;;  %s1975_s26 = sshll.u32 %s3314_s23, 2  ;;  %vm1772_vm4 = vcmask 519168  }
  0x10   : > { %v2303_v11 = vld [vmem:[%s2506_s7 + $0x4] sm:$0xf]  ;;  %v1980_v12 = vld [vmem:[%s2506_s7 + $0x8] sm:$0xf0]  ;;  %v2337_v15 = vld [vmem:[%s2506_s7 + $0x114] sm:$0xf]  ;;  %s2767_s28 = scalar_lea.vmem %s3308_s4, %s1975_s26 }
  0x11   : > { %v972_v8 = vand.u32 %v970_v7, %v860_v6  ;;  %975 = vmatpush.bf16.msra.mxu0 %v2373_v3  ;;  %2377 = vmatpush.bf16.msra.mxu2 %v2373_v3  ;;  %v1983_v13 = vor.u32 %v2303_v11, %v1980_v12  ;;  %v2116_v16 = vld [vmem:[%s2506_s7 + $0x118] sm:$0xf0]  ;;  %v2305_v21 = vld [vmem:[%s2506_s7 + $0x14] sm:$0xf]  ;;  %v2339_v23 = vld [vmem:[%s2506_s7 + $0x124] sm:$0xf] }
  0x12   : > { %v2119_v17 = vor.u32 %v2337_v15, %v2116_v16  ;;  %v1988_v22 = vld [vmem:[%s2506_s7 + $0x18] sm:$0xf0]  ;;  %v2124_v24 = vld [vmem:[%s2506_s7 + $0x128] sm:$0xf0]  ;;  %v1978_v27 = vld [vmem:[%s2506_s7] sm:$0xf] }
  0x13   : > { %1149 = vmatpush.bf16.msra.mxu1 %v972_v8  ;;  %2384 = vmatpush.bf16.msra.mxu3 %v972_v8  ;;  %v1991_v25 = vor.u32 %v2305_v21, %v1988_v22  ;;  %v2304_v28 = vld [vmem:[%s2506_s7 + $0x4] sm:$0xf0]  ;;  %v2106_v29 = vld [vmem:[%s2506_s7 + $0x100] sm:$0xf]  ;;  %v2127_v31 = vor.u32 %v2339_v23, %v2124_v24  ;;  %v2307_v34 = vld [vmem:[%s2506_s7 + $0x24] sm:$0xf] }
  0x14   : > { %v2336_v30 = vld [vmem:[%s2506_s7 + $0x104] sm:$0xf0]  ;;  %v1979_v32 = vor.u32 %v2304_v28, %v1978_v27  ;;  %v1996_v35 = vld [vmem:[%s2506_s7 + $0x28] sm:$0xf0]  ;;  %v2341_v36 = vld [vmem:[%s2506_s7 + $0x134] sm:$0xf] }
  0x15   : > { %976 = vmatpush.bf16.msra.mxu0 %v2372_v9  ;;  %2378 = vmatpush.bf16.msra.mxu2 %v2372_v9  ;;  %v2107_v33 = vor.u32 %v2336_v30, %v2106_v29  ;;  %v2132_v37 = vld [vmem:[%s2506_s7 + $0x138] sm:$0xf0]  ;;  %v1999_v38 = vor.u32 %v2307_v34, %v1996_v35  ;;  %v1986_v39 = vld [vmem:[%s2506_s7 + $0x10] sm:$0xf]  ;;  %v2306_v40 = vld [vmem:[%s2506_s7 + $0x14] sm:$0xf0] }
  0x16   : > { %v2114_v41 = vld [vmem:[%s2506_s7 + $0x110] sm:$0xf]  ;;  %v2338_v42 = vld [vmem:[%s2506_s7 + $0x114] sm:$0xf0]  ;;  %v2135_v43 = vor.u32 %v2341_v36, %v2132_v37  ;;  %v1987_v44 = vor.u32 %v2306_v40, %v1986_v39  ;;  %v2309_v46 = vld [vmem:[%s2506_s7 + $0x34] sm:$0xf] }
  0x17   : > { %1150 = vmatpush.bf16.msra.mxu1 %v2375_v10  ;;  %2385 = vmatpush.bf16.msra.mxu3 %v2375_v10  ;;  %v2115_v45 = vor.u32 %v2338_v42, %v2114_v41  ;;  %v2004_v47 = vld [vmem:[%s2506_s7 + $0x38] sm:$0xf0]  ;;  %v2343_v48 = vld [vmem:[%s2506_s7 + $0x144] sm:$0xf]  ;;  %v2140_v49 = vld [vmem:[%s2506_s7 + $0x148] sm:$0xf0] }
  0x18   : > { %v2007_v50 = vor.u32 %v2309_v46, %v2004_v47  ;;  %v1994_v51 = vld [vmem:[%s2506_s7 + $0x20] sm:$0xf]  ;;  %v2308_v52 = vld [vmem:[%s2506_s7 + $0x24] sm:$0xf0]  ;;  %v2143_v55 = vor.u32 %v2343_v48, %v2140_v49  ;;  %v2311_v58 = vld [vmem:[%s2506_s7 + $0x44] sm:$0xf] }
  0x19   : > { %977 = vmatpush.bf16.msra.mxu0 %v2371_v14  ;;  %2379 = vmatpush.bf16.msra.mxu2 %v2371_v14  ;;  %v2122_v53 = vld [vmem:[%s2506_s7 + $0x120] sm:$0xf]  ;;  %v2340_v54 = vld [vmem:[%s2506_s7 + $0x124] sm:$0xf0]  ;;  %v1995_v56 = vor.u32 %v2308_v52, %v1994_v51  ;;  %v2012_v59 = vld [vmem:[%s2506_s7 + $0x48] sm:$0xf0] }
  0x1a   : > { %2268 = vmatmul.msk.bf16.vlgmr.msra.gmra.mxu1 %vm870_vm2, %v1983_v13  ;;  %2285 = vmatmul.msk.bf16.vlgmr.msra.gmra.mxu3 %vm870_vm2, %v2119_v17  ;;  %v2123_v57 = vor.u32 %v2340_v54, %v2122_v53  ;;  %v2345_v60 = vld [vmem:[%s2506_s7 + $0x154] sm:$0xf]  ;;  %v2148_v61 = vld [vmem:[%s2506_s7 + $0x158] sm:$0xf0]  ;;  %v2015_v62 = vor.u32 %v2311_v58, %v2012_v59  ;;  %v2002_v63 = vld [vmem:[%s2506_s7 + $0x30] sm:$0xf] }
  0x1b   : > { %v2310_v0 = vld [vmem:[%s2506_s7 + $0x34] sm:$0xf0]  ;;  %v2130_v1 = vld [vmem:[%s2506_s7 + $0x130] sm:$0xf]  ;;  %v2151_v3 = vor.u32 %v2345_v60, %v2148_v61  ;;  %v2313_v6 = vld [vmem:[%s2506_s7 + $0x54] sm:$0xf] }
  0x1c   : > { %v2342_v2 = vld [vmem:[%s2506_s7 + $0x134] sm:$0xf0]  ;;  %v2003_v4 = vor.u32 %v2310_v0, %v2002_v63  ;;  %v2020_v7 = vld [vmem:[%s2506_s7 + $0x58] sm:$0xf0]  ;;  %v2347_v8 = vld [vmem:[%s2506_s7 + $0x164] sm:$0xf] }
  0x1d   : > { %978 = vmatpush.bf16.msra.mxu0 %v2370_v18  ;;  %2380 = vmatpush.bf16.msra.mxu2 %v2370_v18  ;;  %v2131_v5 = vor.u32 %v2342_v2, %v2130_v1  ;;  %v2156_v9 = vld [vmem:[%s2506_s7 + $0x168] sm:$0xf0]  ;;  %v2023_v10 = vor.u32 %v2313_v6, %v2020_v7  ;;  %v2010_v11 = vld [vmem:[%s2506_s7 + $0x40] sm:$0xf]  ;;  %v2312_v12 = vld [vmem:[%s2506_s7 + $0x44] sm:$0xf0] }
  0x1e   : > { %v2138_v13 = vld [vmem:[%s2506_s7 + $0x140] sm:$0xf]  ;;  %v2344_v14 = vld [vmem:[%s2506_s7 + $0x144] sm:$0xf0]  ;;  %v2159_v15 = vor.u32 %v2347_v8, %v2156_v9  ;;  %v2011_v16 = vor.u32 %v2312_v12, %v2010_v11  ;;  %v2315_v18 = vld [vmem:[%s2506_s7 + $0x64] sm:$0xf] }
  0x1f   : > { %v2139_v17 = vor.u32 %v2344_v14, %v2138_v13  ;;  %v2164_v21 = vld [vmem:[%s2506_s7 + $0x178] sm:$0xf0]  ;;  %v2018_v23 = vld [vmem:[%s2506_s7 + $0x50] sm:$0xf]  ;;  %v2314_v24 = vld [vmem:[%s2506_s7 + $0x54] sm:$0xf0] }
  0x20   : > { %v2019_v28 = vor.u32 %v2314_v24, %v2018_v23  ;;  %v2317_v30 = vld [vmem:[%s2506_s7 + $0x74] sm:$0xf]  ;;  %v2026_v35 = vld [vmem:[%s2506_s7 + $0x60] sm:$0xf]  ;;  %v2316_v36 = vld [vmem:[%s2506_s7 + $0x64] sm:$0xf0] }
  0x21   : > { %979 = vmatpush.bf16.msra.mxu0 %v2369_v19  ;;  %2381 = vmatpush.bf16.msra.mxu2 %v2369_v19  ;;  %v2028_v19 = vld [vmem:[%s2506_s7 + $0x68] sm:$0xf0]  ;;  %v2441_v37 = vmov 0.0   ;;  %v2348_v39 = vld [vmem:[%s2506_s7 + $0x164] sm:$0xf0]  ;;  %v2027_v41 = vor.u32 %v2316_v36, %v2026_v35 }
  0x22   : > { %v2031_v22 = vor.u32 %v2315_v18, %v2028_v19  ;;  %314 = vst.msk [vmem:[#allocation2] sm:$0xff] %vm313_vm3, %v2441_v37  ;;  %v2034_v46 = vld [vmem:[%s2506_s7 + $0x70] sm:$0xf]  ;;  %v2318_v47 = vld [vmem:[%s2506_s7 + $0x74] sm:$0xf0] }
  0x23   : > { %315 = vst.msk [vmem:[#allocation2 + $0x8] sm:$0xff] %vm313_vm3, %v2441_v37  ;;  %v2162_v49 = vld [vmem:[%s2506_s7 + $0x170] sm:$0xf]  ;;  %v2035_v51 = vor.u32 %v2318_v47, %v2034_v46  ;;  %v2321_v54 = vld [vmem:[%s2506_s7 + $0x94] sm:$0xf] }
  0x24   : > { %316 = vst.msk [vmem:[#allocation2 + $0x10] sm:$0xff] %vm313_vm3, %v2441_v37  ;;  %v2042_v60 = vld [vmem:[%s2506_s7 + $0x80] sm:$0xf]  ;;  %v2320_v61 = vld [vmem:[%s2506_s7 + $0x84] sm:$0xf0] }
  0x25   : > { %980 = vmatpush.bf16.msra.mxu0 %v2368_v20  ;;  %2382 = vmatpush.bf16.msra.mxu2 %v2368_v20  ;;  %v2349_v20 = vld [vmem:[%s2506_s7 + $0x174] sm:$0xf]  ;;  %317 = vst.msk [vmem:[#allocation2 + $0x18] sm:$0xff] %vm313_vm3, %v2441_v37  ;;  %v2170_v63 = vld [vmem:[%s2506_s7 + $0x180] sm:$0xf]  ;;  %v2043_v1 = vor.u32 %v2320_v61, %v2042_v60 }
  0x26   : > { %v2167_v27 = vor.u32 %v2349_v20, %v2164_v21  ;;  %318 = vst.msk [vmem:[#allocation2 + $0x20] sm:$0xff] %vm313_vm3, %v2441_v37  ;;  %v2352_v0 = vld [vmem:[%s2506_s7 + $0x184] sm:$0xf0]  ;;  %v2712_v9 = vld [vmem:[%s3306_s2] ss:$0 sm:$0xff] }
  0x27   : > { %319 = vst.msk [vmem:[#allocation2 + $0x28] sm:$0xff] %vm313_vm3, %v2441_v37  ;;  %v2323_v13 = vld [vmem:[%s2506_s7 + $0xa4] sm:$0xf]  ;;  %v2060_v14 = vld [vmem:[%s2506_s7 + $0xa8] sm:$0xf0] }
  0x28   : > { %320 = vst.msk [vmem:[#allocation2 + $0x30] sm:$0xff] %vm313_vm3, %v2441_v37  ;;  %v2733_v18 = vld [vmem:[%s3307_s3] ss:$0 sm:$0xff]  ;;  %v2063_v20 = vor.u32 %v2323_v13, %v2060_v14  ;;  %v2050_v21 = vld [vmem:[%s2506_s7 + $0x90] sm:$0xf] }
  0x29   : > { %981 = vmatpush.bf16.msra.mxu0 %v2367_v26  ;;  %2383 = vmatpush.bf16.msra.mxu2 %v2367_v26  ;;  %v2346_v26 = vld [vmem:[%s2506_s7 + $0x154] sm:$0xf0]  ;;  %321 = vst.msk [vmem:[#allocation2 + $0x38] sm:$0xff] %vm313_vm3, %v2441_v37  ;;  %v2068_v46 = vld [vmem:[%s2506_s7 + $0xb8] sm:$0xf0] }
  0x2a   : > { %2269 = vmatmul.msk.bf16.gmra.mxu1 %vm870_vm2, %v1991_v25  ;;  %2286 = vmatmul.msk.bf16.gmra.mxu3 %vm870_vm2, %v2127_v31  ;;  %v2146_v25 = vld [vmem:[%s2506_s7 + $0x150] sm:$0xf]  ;;  %v2036_v31 = vld [vmem:[%s2506_s7 + $0x78] sm:$0xf0]  ;;  %322 = vst.msk [vmem:[#allocation2 + $0x40] sm:$0xff] %vm313_vm3, %v2441_v37 }
  0x2b   : > { %v2147_v29 = vor.u32 %v2346_v26, %v2146_v25  ;;  %v2039_v34 = vor.u32 %v2317_v30, %v2036_v31  ;;  %323 = vst.msk [vmem:[#allocation2 + $0x48] sm:$0xff] %vm313_vm3, %v2441_v37  ;;  %v2178_v25 = vld [vmem:[%s2506_s7 + $0x190] sm:$0xf]  ;;  %v2354_v26 = vld [vmem:[%s2506_s7 + $0x194] sm:$0xf0] }
  0x2c   : > { %982 = vmatmul.bf16.vlgmr.msra.gmra.mxu0 %v1979_v32  ;;  %1062 = vmatmul.bf16.vlgmr.msra.gmra.mxu2 %v2107_v33  ;;  %v2351_v32 = vld [vmem:[%s2506_s7 + $0x184] sm:$0xf]  ;;  %v2172_v33 = vld [vmem:[%s2506_s7 + $0x188] sm:$0xf0]  ;;  %324 = vst.msk [vmem:[#allocation2 + $0x50] sm:$0xff] %vm313_vm3, %v2441_v37 }
  0x2d   : > { %v2175_v40 = vor.u32 %v2351_v32, %v2172_v33  ;;  %325 = vst.msk [vmem:[#allocation2 + $0x58] sm:$0xff] %vm313_vm3, %v2441_v37  ;;  %v2179_v32 = vor.u32 %v2354_v26, %v2178_v25  ;;  %v2186_v61 = vld [vmem:[%s2506_s7 + $0x1a0] sm:$0xf] }
  0x2e   : > { %326 = vst.msk [vmem:[#allocation2 + $0x60] sm:$0xff] %vm313_vm3, %v2441_v37  ;;  %v383_v25 = vld [vmem:[#allocation2 + $0x28] sm:$0xff] }
  0x2f   : > { %327 = vst.msk [vmem:[#allocation2 + $0x68] sm:$0xff] %vm313_vm3, %v2441_v37 }
  0x30   : > { %328 = vst.msk [vmem:[#allocation2 + $0x70] sm:$0xff] %vm313_vm3, %v2441_v37 }
  0x31   : > { %329 = vst.msk [vmem:[#allocation2 + $0x78] sm:$0xff] %vm313_vm3, %v2441_v37 }
  0x32   : > { %330 = vst.msk [vmem:[#allocation2 + $0x80] sm:$0xff] %vm313_vm3, %v2441_v37 }
  0x33   : > { %331 = vst.msk [vmem:[#allocation2 + $0x88] sm:$0xff] %vm313_vm3, %v2441_v37 }
  0x34   : > { %332 = vst.msk [vmem:[#allocation2 + $0x90] sm:$0xff] %vm313_vm3, %v2441_v37 }
  0x35   : > { %333 = vst.msk [vmem:[#allocation2 + $0x98] sm:$0xff] %vm313_vm3, %v2441_v37 }
  0x36   : > { %334 = vst.msk [vmem:[#allocation2 + $0xa0] sm:$0xff] %vm313_vm3, %v2441_v37 }
  0x37   : > { %335 = vst.msk [vmem:[#allocation2 + $0xa8] sm:$0xff] %vm313_vm3, %v2441_v37 }
  0x38   : > { %336 = vst.msk [vmem:[#allocation2 + $0xb0] sm:$0xff] %vm313_vm3, %v2441_v37 }
  0x39   : > { %337 = vst.msk [vmem:[#allocation2 + $0xb8] sm:$0xff] %vm313_vm3, %v2441_v37 }
  0x3a   : > { %2270 = vmatmul.msk.bf16.gmra.mxu1 %vm870_vm2, %v1999_v38  ;;  %2287 = vmatmul.msk.bf16.gmra.mxu3 %vm870_vm2, %v2135_v43  ;;  %v2154_v38 = vld [vmem:[%s2506_s7 + $0x160] sm:$0xf]  ;;  %v2319_v43 = vld [vmem:[%s2506_s7 + $0x84] sm:$0xf]  ;;  %338 = vst.msk [vmem:[#allocation2 + $0xc0] sm:$0xff] %vm313_vm3, %v2441_v37 }
  0x3b   : > { %v2155_v42 = vor.u32 %v2348_v39, %v2154_v38  ;;  %339 = vst.msk [vmem:[#allocation2 + $0xc8] sm:$0xff] %vm313_vm3, %v2441_v37  ;;  %v379_v38 = vld [vmem:[#allocation2 + $0x8] sm:$0xff] }
  0x3c   : > { %987 = vmatmul.bf16.gmra.mxu0 %v1987_v44  ;;  %1067 = vmatmul.bf16.gmra.mxu2 %v2115_v45  ;;  %v2044_v44 = vld [vmem:[%s2506_s7 + $0x88] sm:$0xf0]  ;;  %340 = vst.msk [vmem:[#allocation2 + $0xd0] sm:$0xff] %vm313_vm3, %v2441_v37 }
  0x3d   : > { %v2047_v45 = vor.u32 %v2319_v43, %v2044_v44  ;;  %341 = vst.msk [vmem:[#allocation2 + $0xd8] sm:$0xff] %vm313_vm3, %v2441_v37 }
  0x3e   : > { %342 = vst.msk [vmem:[#allocation2 + $0xe0] sm:$0xff] %vm313_vm3, %v2441_v37 }
  0x3f   : > { %343 = vst.msk [vmem:[#allocation2 + $0xe8] sm:$0xff] %vm313_vm3, %v2441_v37 }
  0x40   : > { %344 = vst.msk [vmem:[#allocation2 + $0xf0] sm:$0xff] %vm313_vm3, %v2441_v37 }
  0x41   : > { %345 = vst.msk [vmem:[#allocation2 + $0xf8] sm:$0xff] %vm313_vm3, %v2441_v37 }
  0x42   : > { %346 = vst.msk [vmem:[#allocation2 + $0x100] sm:$0xff] %vm313_vm3, %v2441_v37 }
  0x43   : > { %347 = vst.msk [vmem:[#allocation2 + $0x108] sm:$0xff] %vm313_vm3, %v2441_v37 }
  0x44   : > { %348 = vst.msk [vmem:[#allocation2 + $0x110] sm:$0xff] %vm313_vm3, %v2441_v37 }
  0x45   : > { %349 = vst.msk [vmem:[#allocation2 + $0x118] sm:$0xff] %vm313_vm3, %v2441_v37 }
  0x46   : > { %350 = vst.msk [vmem:[#allocation2 + $0x120] sm:$0xff] %vm313_vm3, %v2441_v37 }
  0x47   : > { %351 = vst.msk [vmem:[#allocation2 + $0x128] sm:$0xff] %vm313_vm3, %v2441_v37 }
  0x48   : > { %352 = vst.msk [vmem:[#allocation2 + $0x130] sm:$0xff] %vm313_vm3, %v2441_v37 }
  0x49   : > { %353 = vst.msk [vmem:[#allocation2 + $0x138] sm:$0xff] %vm313_vm3, %v2441_v37 }
  0x4a   : > { %2271 = vmatmul.msk.bf16.gmra.mxu1 %vm870_vm2, %v2007_v50  ;;  %2288 = vmatmul.msk.bf16.gmra.mxu3 %vm870_vm2, %v2143_v55  ;;  %v2350_v50 = vld [vmem:[%s2506_s7 + $0x174] sm:$0xf0]  ;;  %v2052_v55 = vld [vmem:[%s2506_s7 + $0x98] sm:$0xf0]  ;;  %354 = vst.msk [vmem:[#allocation2 + $0x140] sm:$0xff] %vm313_vm3, %v2441_v37 }
  0x4b   : > { %v2163_v52 = vor.u32 %v2350_v50, %v2162_v49  ;;  %v2055_v59 = vor.u32 %v2321_v54, %v2052_v55  ;;  %355 = vst.msk [vmem:[#allocation2 + $0x148] sm:$0xff] %vm313_vm3, %v2441_v37  ;;  %v412_v47 = vld [vmem:[#allocation2 + $0x110] sm:$0xff]  ;;  %v2196_v50 = vld [vmem:[%s2506_s7 + $0x1b8] sm:$0xf0] }
  0x4c   : > { %992 = vmatmul.bf16.gmra.mxu0 %v1995_v56  ;;  %1072 = vmatmul.bf16.gmra.mxu2 %v2123_v57  ;;  %v2353_v56 = vld [vmem:[%s2506_s7 + $0x194] sm:$0xf]  ;;  %v2180_v57 = vld [vmem:[%s2506_s7 + $0x198] sm:$0xf0]  ;;  %356 = vst.msk [vmem:[#allocation2 + $0x150] sm:$0xff] %vm313_vm3, %v2441_v37 }
  0x4d   : > { %v2183_v58 = vor.u32 %v2353_v56, %v2180_v57  ;;  %357 = vst.msk [vmem:[#allocation2 + $0x158] sm:$0xff] %vm313_vm3, %v2441_v37  ;;  %v2357_v49 = vld [vmem:[%s2506_s7 + $0x1b4] sm:$0xf]  ;;  %v2058_v57 = vld [vmem:[%s2506_s7 + $0xa0] sm:$0xf] }
  0x4e   : > { %358 = vst.msk [vmem:[#allocation2 + $0x160] sm:$0xff] %vm313_vm3, %v2441_v37 }
  0x4f   : > { %359 = vst.msk [vmem:[#allocation2 + $0x168] sm:$0xff] %vm313_vm3, %v2441_v37 }
  0x50   : > { %360 = vst.msk [vmem:[#allocation2 + $0x170] sm:$0xff] %vm313_vm3, %v2441_v37 }
  0x51   : > { %361 = vst.msk [vmem:[#allocation2 + $0x178] sm:$0xff] %vm313_vm3, %v2441_v37 }
  0x52   : > { %362 = vst.msk [vmem:[#allocation2 + $0x180] sm:$0xff] %vm313_vm3, %v2441_v37 }
  0x53   : > { %363 = vst.msk [vmem:[#allocation2 + $0x188] sm:$0xff] %vm313_vm3, %v2441_v37 }
  0x54   : > { %364 = vst.msk [vmem:[#allocation2 + $0x190] sm:$0xff] %vm313_vm3, %v2441_v37 }
  0x55   : > { %365 = vst.msk [vmem:[#allocation2 + $0x198] sm:$0xff] %vm313_vm3, %v2441_v37 }
  0x56   : > { %366 = vst.msk [vmem:[#allocation2 + $0x1a0] sm:$0xff] %vm313_vm3, %v2441_v37 }
  0x57   : > { %367 = vst.msk [vmem:[#allocation2 + $0x1a8] sm:$0xff] %vm313_vm3, %v2441_v37 }
  0x58   : > { %368 = vst.msk [vmem:[#allocation2 + $0x1b0] sm:$0xff] %vm313_vm3, %v2441_v37 }
  0x59   : > { %369 = vst.msk [vmem:[#allocation2 + $0x1b8] sm:$0xff] %vm313_vm3, %v2441_v37 }
  0x5a   : > { %2272 = vmatmul.msk.bf16.gmra.mxu1 %vm870_vm2, %v2015_v62  ;;  %2289 = vmatmul.msk.bf16.gmra.mxu3 %vm870_vm2, %v2151_v3  ;;  %v378_v3 = vld [vmem:[#allocation2] sm:$0xff]  ;;  %370 = vst.msk [vmem:[#allocation2 + $0x1c0] sm:$0xff] %vm313_vm3, %v2441_v37 }
  0x5b   : > { %371 = vst.msk [vmem:[#allocation2 + $0x1c8] sm:$0xff] %vm313_vm3, %v2441_v37 }
  0x5c   : > { %997 = vmatmul.bf16.gmra.mxu0 %v2003_v4  ;;  %1077 = vmatmul.bf16.gmra.mxu2 %v2131_v5  ;;  %v2171_v5 = vor.u32 %v2352_v0, %v2170_v63  ;;  %372 = vst.msk [vmem:[#allocation2 + $0x1d0] sm:$0xff] %vm313_vm3, %v2441_v37  ;;  %v413_v63 = vld [vmem:[#allocation2 + $0x118] sm:$0xff] }
  0x5d   : > { %373 = vst.msk [vmem:[#allocation2 + $0x1d8] sm:$0xff] %vm313_vm3, %v2441_v37 }
  0x5e   : > { %374 = vst.msk [vmem:[#allocation2 + $0x1e0] sm:$0xff] %vm313_vm3, %v2441_v37 }
  0x5f   : > { %375 = vst.msk [vmem:[#allocation2 + $0x1e8] sm:$0xff] %vm313_vm3, %v2441_v37 }
  0x60   : > { %376 = vst.msk [vmem:[#allocation2 + $0x1f0] sm:$0xff] %vm313_vm3, %v2441_v37 }
  0x61   : > { %377 = vst.msk [vmem:[#allocation2 + $0x1f8] sm:$0xff] %vm313_vm3, %v2441_v37  ;;  %v382_v37 = vld [vmem:[#allocation2 + $0x20] sm:$0xff] }
  0x6a   : > { %2273 = vmatmul.msk.bf16.gmra.mxu1 %vm870_vm2, %v2023_v10  ;;  %2290 = vmatmul.msk.bf16.gmra.mxu3 %vm870_vm2, %v2159_v15  ;;  %v2355_v15 = vld [vmem:[%s2506_s7 + $0x1a4] sm:$0xf] }
  0x6c   : > { %1002 = vmatmul.bf16.gmra.mxu0 %v2011_v16  ;;  %1082 = vmatmul.bf16.gmra.mxu2 %v2139_v17  ;;  %v2188_v16 = vld [vmem:[%s2506_s7 + $0x1a8] sm:$0xf0] }
  0x6d   : > { %v2191_v17 = vor.u32 %v2355_v15, %v2188_v16 }
  0x7a   : > { %2274 = vmatmul.msk.bf16.gmra.mxu1 %vm870_vm2, %v2031_v22  ;;  %2291 = vmatmul.msk.bf16.gmra.mxu3 %vm870_vm2, %v2167_v27  ;;  %v2322_v22 = vld [vmem:[%s2506_s7 + $0x94] sm:$0xf0] }
  0x7c   : > { %1007 = vmatmul.bf16.gmra.mxu0 %v2019_v28  ;;  %1087 = vmatmul.bf16.gmra.mxu2 %v2147_v29  ;;  %v2051_v29 = vor.u32 %v2322_v22, %v2050_v21 }
  0x8a   : > { %2275 = vmatmul.msk.bf16.gmra.mxu1 %vm870_vm2, %v2039_v34  ;;  %2292 = vmatmul.msk.bf16.gmra.mxu3 %vm870_vm2, %v2175_v40 }
  0x8c   : > { %1012 = vmatmul.bf16.gmra.mxu0 %v2027_v41  ;;  %1092 = vmatmul.bf16.gmra.mxu2 %v2155_v42  ;;  %v380_v42 = vld [vmem:[#allocation2 + $0x10] sm:$0xff] }
  0x97   : > { %v1152_v48 = vpop.f32.mrf.mxu1 }
  0x9a   : > { %2276 = vmatmul.msk.bf16.gmra.mxu1 %vm870_vm2, %v2047_v45  ;;  %2293 = vmatmul.msk.bf16.gmra.mxu3 %vm870_vm2, %v2183_v58  ;;  %v2325_v45 = vld [vmem:[%s2506_s7 + $0xb4] sm:$0xf]  ;;  %v2324_v58 = vld [vmem:[%s2506_s7 + $0xa4] sm:$0xf0] }
  0x9b   : > { %v2071_v56 = vor.u32 %v2325_v45, %v2068_v46  ;;  %v2066_v46 = vld [vmem:[%s2506_s7 + $0xb0] sm:$0xf] }
  0x9c   : > { %1017 = vmatmul.bf16.gmra.mxu0 %v2035_v51  ;;  %1097 = vmatmul.bf16.gmra.mxu2 %v2163_v52  ;;  %v381_v52 = vld [vmem:[#allocation2 + $0x18] sm:$0xff] }
  0x9d   : > { %v2691_v2 = vpop.f32.mrf.mxu3 }
  0x9f   : > { %v2656_v53 = vpop.f32.mrf.mxu1 }
  0xa5   : > { %v2718_v11 = vpop.f32.mrf.mxu3 }
  0xa7   : > { %v2681_v62 = vpop.f32.mrf.mxu1 }
  0xa9   : > { %v983_v4 = vpop.f32.mrf.mxu0 }
  0xaa   : > { %2277 = vmatmul.msk.bf16.gmra.mxu1 %vm870_vm2, %v2055_v59  ;;  %v1153_v6 = vadd.f32 %v1152_v48, %v983_v4  ;;  %2294 = vmatmul.msk.bf16.gmra.mxu3 %vm870_vm2, %v2191_v17  ;;  %v414_v17 = vld [vmem:[#allocation2 + $0x120] sm:$0xff] }
  0xac   : > { %v1312_v7 = vadd.f32 %v1153_v6, %v378_v3  ;;  %1022 = vmatmul.bf16.gmra.mxu0 %v2043_v1  ;;  %1102 = vmatmul.bf16.gmra.mxu2 %v2171_v5  ;;  %v2059_v1 = vor.u32 %v2324_v58, %v2058_v57  ;;  %v2358_v57 = vld [vmem:[%s2506_s7 + $0x1b4] sm:$0xf0] }
  0xad   : > { %v2757_v30 = vpop.f32.mrf.mxu3 }
  0xae   : > { %1377 = vst.msk [vmem:[#allocation2] sm:$0xff] %vm313_vm3, %v1312_v7 }
  0xaf   : > { %v2705_v8 = vpop.f32.mrf.mxu1  ;;  %v2716_v10 = vpop.f32.mrf.mxu2 }
  0xb1   : > { %v985_v12 = vpop.f32.mrf.mxu0 }
  0xb2   : > { %v1155_v36 = vadd.f32 %v2656_v53, %v985_v12  ;;  %v2199_v53 = vor.u32 %v2357_v49, %v2196_v50 }
  0xb4   : > { %v1313_v51 = vadd.f32 %v1155_v36, %v379_v38  ;;  %v2204_v36 = vld [vmem:[%s2506_s7 + $0x1c8] sm:$0xf0] }
  0xb5   : > { %v1444_v19 = vld [vmem:[#allocation2] sm:$0xff]  ;;  %v2785_v41 = vpop.f32.mrf.mxu3 }
  0xb6   : > { %v1512_v23 = vmul.f32 %v2712_v9, %v1444_v19  ;;  %1378 = vst.msk [vmem:[#allocation2 + $0x8] sm:$0xff] %vm313_vm3, %v1313_v51  ;;  %v2326_v51 = vld [vmem:[%s2506_s7 + $0xb4] sm:$0xf0] }
  0xb7   : > { %v2745_v24 = vpop.f32.mrf.mxu1  ;;  %v2755_v28 = vpop.f32.mrf.mxu2 }
  0xb8   : > { %v1580_v27 = vadd.f32 %v2733_v18, %v1512_v23 }
  0xb9   : > { %v988_v31 = vpop.f32.mrf.mxu0 }
  0xba   : > { %2278 = vmatmul.msk.bf16.gmra.mxu1 %vm870_vm2, %v2063_v20  ;;  %v1644_v33 = vmax.f32 %v1580_v27, 0.0  ;;  %v1158_v39 = vadd.f32 %v2681_v62, %v988_v31  ;;  %2295 = vmatmul.msk.bf16.gmra.mxu3 %vm870_vm2, %v2199_v53  ;;  %v2356_v62 = vld [vmem:[%s2506_s7 + $0x1a4] sm:$0xf0]  ;;  %v2327_v27 = vld [vmem:[%s2506_s7 + $0xc4] sm:$0xf] }
  0xbb   : > { %v2187_v5 = vor.u32 %v2356_v62, %v2186_v61 }
  0xbc   : > { %v1708_v34 = vpack.c.bf16 %v1644_v33, %v1644_v33  ;;  %1027 = vmatmul.bf16.gmra.mxu0 %v2051_v29  ;;  %1107 = vmatmul.bf16.gmra.mxu2 %v2179_v32  ;;  %v1314_v54 = vadd.f32 %v1158_v39, %v380_v42  ;;  %v2076_v33 = vld [vmem:[%s2506_s7 + $0xc8] sm:$0xf0] }
  0xbd   : > { %v1445_v12 = vld [vmem:[#allocation2 + $0x8] sm:$0xff]  ;;  %v2079_v50 = vor.u32 %v2327_v27, %v2076_v33  ;;  %v2329_v33 = vld [vmem:[%s2506_s7 + $0xd4] sm:$0xf] }
  0xbe   : > { %1773 = vst.msk [vmem:[%s2767_s28] sm:$0xf] %vm1772_vm4, %v1708_v34  ;;  %v1513_v13 = vmul.f32 %v2712_v9, %v1445_v12  ;;  %v2359_v34 = vld [vmem:[%s2506_s7 + $0x1c4] sm:$0xf] }
  0xbf   : > { %v2777_v35 = vpop.f32.mrf.mxu1  ;;  %v1068_v40 = vpop.f32.mrf.mxu2  ;;  %1379 = vst.msk [vmem:[#allocation2 + $0x10] sm:$0xff] %vm313_vm3, %v1314_v54  ;;  %v2207_v42 = vor.u32 %v2359_v34, %v2204_v36  ;;  %v2084_v34 = vld [vmem:[%s2506_s7 + $0xd8] sm:$0xf0] }
  0xc0   : > { %v1238_v43 = vadd.f32 %v2691_v2, %v1068_v40  ;;  %v2814_v2 = vpop.f32.mrf.mxu3  ;;  %v1581_v21 = vadd.f32 %v2733_v18, %v1513_v13 }
  0xc1   : > { %v990_v44 = vpop.f32.mrf.mxu0 }
  0xc2   : > { %v1160_v48 = vadd.f32 %v2705_v8, %v990_v44  ;;  %v1346_v55 = vadd.f32 %v1238_v43, %v412_v47  ;;  %v1645_v38 = vmax.f32 %v1581_v21, 0.0 }
  0xc4   : > { %v1315_v59 = vadd.f32 %v1160_v48, %v381_v52  ;;  %1411 = vst.msk [vmem:[#allocation2 + $0x110] sm:$0xff] %vm313_vm3, %v1346_v55  ;;  %v1709_v47 = vpack.c.bf16 %v1645_v38, %v1645_v38 }
  0xc6   : > { %1380 = vst.msk [vmem:[#allocation2 + $0x18] sm:$0xff] %vm313_vm3, %v1315_v59  ;;  %v1446_v14 = vld [vmem:[#allocation2 + $0x10] sm:$0xff] }
  0xc7   : > { %v2808_v60 = vpop.f32.mrf.mxu1  ;;  %v1070_v0 = vpop.f32.mrf.mxu2  ;;  %v1514_v15 = vmul.f32 %v2712_v9, %v1446_v14  ;;  %1774 = vst.msk [vmem:[%s2767_s28 + $0x4] sm:$0xf] %vm1772_vm4, %v1709_v47  ;;  %v2328_v47 = vld [vmem:[%s2506_s7 + $0xc4] sm:$0xf0] }
  0xc8   : > { %v1240_v3 = vadd.f32 %v2718_v11, %v1070_v0  ;;  %v2827_v20 = vpop.f32.mrf.mxu3 }
  0xc9   : > { %v993_v4 = vpop.f32.mrf.mxu0  ;;  %v1582_v29 = vadd.f32 %v2733_v18, %v1514_v15 }
  0xca   : > { %2279 = vmatmul.msk.bf16.gmra.mxu1 %vm870_vm2, %v2071_v56  ;;  %v1163_v6 = vadd.f32 %v2745_v24, %v993_v4  ;;  %v1347_v7 = vadd.f32 %v1240_v3, %v413_v63  ;;  %2296 = vmatmul.msk.bf16.gmra.mxu3 %vm870_vm2, %v2207_v42  ;;  %v2194_v56 = vld [vmem:[%s2506_s7 + $0x1b0] sm:$0xf]  ;;  %v415_v63 = vld [vmem:[#allocation2 + $0x128] sm:$0xff] }
  0xcb   : > { %v1478_v16 = vld [vmem:[#allocation2 + $0x110] sm:$0xff] }
  0xcc   : > { %v1316_v8 = vadd.f32 %v1163_v6, %v382_v37  ;;  %1032 = vmatmul.bf16.gmra.mxu0 %v2059_v1  ;;  %1412 = vst.msk [vmem:[#allocation2 + $0x118] sm:$0xff] %vm313_vm3, %v1347_v7  ;;  %1112 = vmatmul.bf16.gmra.mxu2 %v2187_v5  ;;  %v1546_v22 = vmul.f32 %v2712_v9, %v1478_v16  ;;  %v384_v5 = vld [vmem:[#allocation2 + $0x30] sm:$0xff] }
  0xcd   : > { %v1447_v23 = vld [vmem:[#allocation2 + $0x18] sm:$0xff]  ;;  %v2067_v1 = vor.u32 %v2326_v51, %v2066_v46  ;;  %v2195_v7 = vor.u32 %v2358_v57, %v2194_v56  ;;  %v2074_v46 = vld [vmem:[%s2506_s7 + $0xc0] sm:$0xf] }
  0xce   : > { %1381 = vst.msk [vmem:[#allocation2 + $0x20] sm:$0xff] %vm313_vm3, %v1316_v8  ;;  %v1515_v31 = vmul.f32 %v2712_v9, %v1447_v23  ;;  %v1614_v39 = vadd.f32 %v2733_v18, %v1546_v22  ;;  %v2075_v56 = vor.u32 %v2328_v47, %v2074_v46  ;;  %v2362_v47 = vld [vmem:[%s2506_s7 + $0x1d4] sm:$0xf0] }
  0xcf   : > { %v2823_v11 = vpop.f32.mrf.mxu1  ;;  %v1073_v19 = vpop.f32.mrf.mxu2 }
  0xd0   : > { %v1243_v24 = vadd.f32 %v2757_v30, %v1073_v19  ;;  %v1646_v30 = vmax.f32 %v1582_v29, 0.0  ;;  %v1583_v43 = vadd.f32 %v2733_v18, %v1515_v31  ;;  %v2858_v3 = vpop.f32.mrf.mxu3  ;;  %v385_v31 = vld [vmem:[#allocation2 + $0x38] sm:$0xff] }
  0xd1   : > { %v995_v26 = vpop.f32.mrf.mxu0 }
  0xd2   : > { %v1165_v32 = vadd.f32 %v2777_v35, %v995_v26  ;;  %v1348_v40 = vadd.f32 %v1243_v24, %v414_v17  ;;  %v1678_v35 = vmax.f32 %v1614_v39, 0.0  ;;  %v1710_v52 = vpack.c.bf16 %v1646_v30, %v1646_v30  ;;  %v416_v24 = vld [vmem:[#allocation2 + $0x130] sm:$0xff] }
  0xd3   : > { %v1479_v44 = vld [vmem:[#allocation2 + $0x118] sm:$0xff]  ;;  %v1647_v53 = vmax.f32 %v1583_v43, 0.0  ;;  %v2361_v39 = vld [vmem:[%s2506_s7 + $0x1d4] sm:$0xf] }
  0xd4   : > { %v1317_v45 = vadd.f32 %v1165_v32, %v383_v25  ;;  %v1547_v48 = vmul.f32 %v2712_v9, %v1479_v44  ;;  %1413 = vst.msk [vmem:[#allocation2 + $0x120] sm:$0xff] %vm313_vm3, %v1348_v40  ;;  %v1742_v58 = vpack.c.bf16 %v1678_v35, %v1678_v35  ;;  %v2212_v40 = vld [vmem:[%s2506_s7 + $0x1d8] sm:$0xf0]  ;;  %v2202_v35 = vld [vmem:[%s2506_s7 + $0x1c0] sm:$0xf] }
  0xd5   : > { %v1448_v49 = vld [vmem:[#allocation2 + $0x20] sm:$0xff]  ;;  %1775 = vst.msk [vmem:[%s2767_s28 + $0x8] sm:$0xf] %vm1772_vm4, %v1710_v52  ;;  %v1711_v61 = vpack.c.bf16 %v1647_v53, %v1647_v53  ;;  %v2215_v43 = vor.u32 %v2361_v39, %v2212_v40  ;;  %v417_v53 = vld [vmem:[#allocation2 + $0x138] sm:$0xff] }
  0xd6   : > { %v1516_v54 = vmul.f32 %v2712_v9, %v1448_v49  ;;  %1382 = vst.msk [vmem:[#allocation2 + $0x28] sm:$0xff] %vm313_vm3, %v1317_v45  ;;  %v1615_v59 = vadd.f32 %v2733_v18, %v1547_v48  ;;  %v2360_v49 = vld [vmem:[%s2506_s7 + $0x1c4] sm:$0xf0] }
  0xd7   : > { %v2848_v55 = vpop.f32.mrf.mxu1  ;;  %v1075_v0 = vpop.f32.mrf.mxu2  ;;  %1807 = vst.msk [vmem:[%s2767_s28 + $0x88] sm:$0xf] %vm1772_vm4, %v1742_v58 }
  0xd8   : > { %v1584_v62 = vadd.f32 %v2733_v18, %v1516_v54  ;;  %v1679_v37 = vmax.f32 %v1615_v59, 0.0  ;;  %v1245_v4 = vadd.f32 %v2785_v41, %v1075_v0  ;;  %1776 = vst.msk [vmem:[%s2767_s28 + $0xc] sm:$0xf] %vm1772_vm4, %v1711_v61  ;;  %v2879_v26 = vpop.f32.mrf.mxu3  ;;  %v386_v61 = vld [vmem:[#allocation2 + $0x40] sm:$0xff] }
  0xd9   : > { %v998_v6 = vpop.f32.mrf.mxu0 }
  0xda   : > { %2280 = vmatmul.msk.bf16.gmra.mxu1 %vm870_vm2, %v2079_v50  ;;  %v1648_v8 = vmax.f32 %v1584_v62, 0.0  ;;  %v1168_v12 = vadd.f32 %v2808_v60, %v998_v6  ;;  %v1743_v13 = vpack.c.bf16 %v1679_v37, %v1679_v37  ;;  %v1349_v14 = vadd.f32 %v1245_v4, %v415_v63  ;;  %2297 = vmatmul.msk.bf16.gmra.mxu3 %vm870_vm2, %v2215_v43  ;;  %v2330_v43 = vld [vmem:[%s2506_s7 + $0xd4] sm:$0xf0] }
  0xdb   : > { %v1480_v16 = vld [vmem:[#allocation2 + $0x120] sm:$0xff]  ;;  %v2203_v63 = vor.u32 %v2360_v49, %v2202_v35  ;;  %v419_v49 = vld [vmem:[#allocation2 + $0x148] sm:$0xff] }
  0xdc   : > { %v1712_v15 = vpack.c.bf16 %v1648_v8, %v1648_v8  ;;  %v1318_v17 = vadd.f32 %v1168_v12, %v384_v5  ;;  %1037 = vmatmul.bf16.gmra.mxu0 %v2067_v1  ;;  %1808 = vst.msk [vmem:[%s2767_s28 + $0x8c] sm:$0xf] %vm1772_vm4, %v1743_v13  ;;  %v1548_v41 = vmul.f32 %v2712_v9, %v1480_v16 }
  0xdd   : > { %v1449_v19 = vld [vmem:[#allocation2 + $0x28] sm:$0xff]  ;;  %1117 = vmatmul.bf16.gmra.mxu2 %v2195_v7  ;;  %1414 = vst.msk [vmem:[#allocation2 + $0x128] sm:$0xff] %vm313_vm3, %v1349_v14 }
  0xde   : > { %1777 = vst.msk [vmem:[%s2767_s28 + $0x10] sm:$0xf] %vm1772_vm4, %v1712_v15  ;;  %v1517_v21 = vmul.f32 %v2712_v9, %v1449_v19  ;;  %v1616_v60 = vadd.f32 %v2733_v18, %v1548_v41  ;;  %v418_v15 = vld [vmem:[#allocation2 + $0x140] sm:$0xff] }
  0xdf   : > { %v2873_v22 = vpop.f32.mrf.mxu1  ;;  %1383 = vst.msk [vmem:[#allocation2 + $0x30] sm:$0xff] %vm313_vm3, %v1318_v17  ;;  %v1078_v25 = vpop.f32.mrf.mxu2 }
  0xe0   : > { %v1585_v23 = vadd.f32 %v2733_v18, %v1517_v21  ;;  %v1680_v27 = vmax.f32 %v1616_v60, 0.0  ;;  %v1248_v29 = vadd.f32 %v2814_v2, %v1078_v25  ;;  %v2087_v2 = vor.u32 %v2329_v33, %v2084_v34  ;;  %v2902_v57 = vpop.f32.mrf.mxu3  ;;  %v387_v21 = vld [vmem:[#allocation2 + $0x48] sm:$0xff] }
  0xe1   : > { %v1000_v32 = vpop.f32.mrf.mxu0 }
  0xe2   : > { %v1649_v36 = vmax.f32 %v1585_v23, 0.0  ;;  %v1170_v38 = vadd.f32 %v2823_v11, %v1000_v32  ;;  %v1744_v42 = vpack.c.bf16 %v1680_v27, %v1680_v27  ;;  %v1350_v30 = vadd.f32 %v1248_v29, %v416_v24  ;;  %v2331_v23 = vld [vmem:[%s2506_s7 + $0xe4] sm:$0xf]  ;;  %v2092_v27 = vld [vmem:[%s2506_s7 + $0xe8] sm:$0xf0] }
  0xe3   : > { %v2363_v29 = vld [vmem:[%s2506_s7 + $0x1e4] sm:$0xf] }
  0xe4   : > { %v1713_v44 = vpack.c.bf16 %v1649_v36, %v1649_v36  ;;  %v1319_v45 = vadd.f32 %v1170_v38, %v385_v31  ;;  %1809 = vst.msk [vmem:[%s2767_s28 + $0x90] sm:$0xf] %vm1772_vm4, %v1744_v42  ;;  %v1481_v48 = vld [vmem:[#allocation2 + $0x128] sm:$0xff] }
  0xe5   : > { %v1549_v50 = vmul.f32 %v2712_v9, %v1481_v48  ;;  %1415 = vst.msk [vmem:[#allocation2 + $0x130] sm:$0xff] %vm313_vm3, %v1350_v30  ;;  %v2220_v31 = vld [vmem:[%s2506_s7 + $0x1e8] sm:$0xf0]  ;;  %v2082_v30 = vld [vmem:[%s2506_s7 + $0xd0] sm:$0xf] }
  0xe6   : > { %1778 = vst.msk [vmem:[%s2767_s28 + $0x14] sm:$0xf] %vm1772_vm4, %v1713_v44  ;;  %v1450_v51 = vld [vmem:[#allocation2 + $0x30] sm:$0xff]  ;;  %v2223_v34 = vor.u32 %v2363_v29, %v2220_v31 }
  0xe7   : > { %v2895_v11 = vpop.f32.mrf.mxu1  ;;  %v1518_v52 = vmul.f32 %v2712_v9, %v1450_v51  ;;  %1384 = vst.msk [vmem:[#allocation2 + $0x38] sm:$0xff] %vm313_vm3, %v1319_v45  ;;  %v1080_v54 = vpop.f32.mrf.mxu2  ;;  %v1617_v58 = vadd.f32 %v2733_v18, %v1549_v50  ;;  %v2083_v51 = vor.u32 %v2330_v43, %v2082_v30  ;;  %v421_v30 = vld [vmem:[#allocation2 + $0x158] sm:$0xff] }
  0xe8   : > { %v1250_v59 = vadd.f32 %v2827_v20, %v1080_v54  ;;  %v2919_v17 = vpop.f32.mrf.mxu3 }
  0xe9   : > { %v1003_v62 = vpop.f32.mrf.mxu0  ;;  %v1586_v0 = vadd.f32 %v2733_v18, %v1518_v52  ;;  %v1681_v37 = vmax.f32 %v1617_v58, 0.0 }
  0xea   : > { %2281 = vmatmul.msk.bf16.gmra.mxu1 %vm870_vm2, %v2087_v2  ;;  %v1173_v1 = vadd.f32 %v2848_v55, %v1003_v62  ;;  %v1351_v4 = vadd.f32 %v1250_v59, %v417_v53  ;;  %2298 = vmatmul.msk.bf16.gmra.mxu3 %vm870_vm2, %v2223_v34  ;;  %v2210_v2 = vld [vmem:[%s2506_s7 + $0x1d0] sm:$0xf]  ;;  %v2090_v34 = vld [vmem:[%s2506_s7 + $0xe0] sm:$0xf] }
  0xeb   : > { %v1650_v5 = vmax.f32 %v1586_v0, 0.0  ;;  %v1745_v7 = vpack.c.bf16 %v1681_v37, %v1681_v37  ;;  %v2211_v59 = vor.u32 %v2362_v47, %v2210_v2 }
  0xec   : > { %v1320_v6 = vadd.f32 %v1173_v1, %v386_v61  ;;  %1042 = vmatmul.bf16.gmra.mxu0 %v2075_v56  ;;  %1416 = vst.msk [vmem:[#allocation2 + $0x138] sm:$0xff] %vm313_vm3, %v1351_v4  ;;  %v1482_v8 = vld [vmem:[#allocation2 + $0x130] sm:$0xff] }
  0xed   : > { %1122 = vmatmul.bf16.gmra.mxu2 %v2203_v63  ;;  %v1714_v20 = vpack.c.bf16 %v1650_v5, %v1650_v5  ;;  %1810 = vst.msk [vmem:[%s2767_s28 + $0x94] sm:$0xf] %vm1772_vm4, %v1745_v7  ;;  %v1550_v55 = vmul.f32 %v2712_v9, %v1482_v8  ;;  %v388_v56 = vld [vmem:[#allocation2 + $0x50] sm:$0xff] }
  0xee   : > { %1385 = vst.msk [vmem:[#allocation2 + $0x40] sm:$0xff] %vm313_vm3, %v1320_v6  ;;  %v1451_v13 = vld [vmem:[#allocation2 + $0x38] sm:$0xff]  ;;  %v420_v8 = vld [vmem:[#allocation2 + $0x150] sm:$0xff] }
  0xef   : > { %v2911_v12 = vpop.f32.mrf.mxu1  ;;  %1779 = vst.msk [vmem:[%s2767_s28 + $0x18] sm:$0xf] %vm1772_vm4, %v1714_v20  ;;  %v1519_v14 = vmul.f32 %v2712_v9, %v1451_v13  ;;  %v1083_v16 = vpop.f32.mrf.mxu2  ;;  %v1618_v41 = vadd.f32 %v2733_v18, %v1550_v55 }
  0xf0   : > { %v1253_v19 = vadd.f32 %v2858_v3, %v1083_v16  ;;  %v2946_v52 = vpop.f32.mrf.mxu3  ;;  %v389_v16 = vld [vmem:[#allocation2 + $0x58] sm:$0xff] }
  0xf1   : > { %v1005_v60 = vpop.f32.mrf.mxu0  ;;  %v1587_v24 = vadd.f32 %v2733_v18, %v1519_v14  ;;  %v1682_v32 = vmax.f32 %v1618_v41, 0.0 }
  0xf2   : > { %v1175_v25 = vadd.f32 %v2873_v22, %v1005_v60  ;;  %v1352_v33 = vadd.f32 %v1253_v19, %v418_v15  ;;  %v2095_v22 = vor.u32 %v2331_v23, %v2092_v27  ;;  %v2333_v19 = vld [vmem:[%s2506_s7 + $0xf4] sm:$0xf] }
  0xf3   : > { %v1651_v36 = vmax.f32 %v1587_v24, 0.0  ;;  %v1483_v38 = vld [vmem:[#allocation2 + $0x138] sm:$0xff]  ;;  %v1746_v39 = vpack.c.bf16 %v1682_v32, %v1682_v32  ;;  %v2365_v24 = vld [vmem:[%s2506_s7 + $0x1f4] sm:$0xf] }
  0xf4   : > { %v1321_v3 = vadd.f32 %v1175_v25, %v387_v21  ;;  %v1551_v40 = vmul.f32 %v2712_v9, %v1483_v38  ;;  %1417 = vst.msk [vmem:[#allocation2 + $0x140] sm:$0xff] %vm313_vm3, %v1352_v33  ;;  %v2100_v21 = vld [vmem:[%s2506_s7 + $0xf8] sm:$0xf0]  ;;  %v2218_v38 = vld [vmem:[%s2506_s7 + $0x1e0] sm:$0xf] }
  0xf5   : > { %v1452_v42 = vld [vmem:[#allocation2 + $0x40] sm:$0xff]  ;;  %v1715_v44 = vpack.c.bf16 %v1651_v36, %v1651_v36  ;;  %1811 = vst.msk [vmem:[%s2767_s28 + $0x98] sm:$0xf] %vm1772_vm4, %v1746_v39  ;;  %v2228_v25 = vld [vmem:[%s2506_s7 + $0x1f8] sm:$0xf0] }
  0xf6   : > { %v1520_v45 = vmul.f32 %v2712_v9, %v1452_v42  ;;  %1386 = vst.msk [vmem:[#allocation2 + $0x48] sm:$0xff] %vm313_vm3, %v1321_v3  ;;  %v1619_v35 = vadd.f32 %v2733_v18, %v1551_v40  ;;  %v2231_v31 = vor.u32 %v2365_v24, %v2228_v25  ;;  %v2332_v36 = vld [vmem:[%s2506_s7 + $0xe4] sm:$0xf0]  ;;  %v2098_v25 = vld [vmem:[%s2506_s7 + $0xf0] sm:$0xf] }
  0xf7   : > { %v2936_v46 = vpop.f32.mrf.mxu1  ;;  %1780 = vst.msk [vmem:[%s2767_s28 + $0x1c] sm:$0xf] %vm1772_vm4, %v1715_v44  ;;  %v1085_v50 = vpop.f32.mrf.mxu2  ;;  %v2364_v39 = vld [vmem:[%s2506_s7 + $0x1e4] sm:$0xf0]  ;;  %v2091_v44 = vor.u32 %v2332_v36, %v2090_v34 }
  0xf8   : > { %v1588_v48 = vadd.f32 %v2733_v18, %v1520_v45  ;;  %v1683_v53 = vmax.f32 %v1619_v35, 0.0  ;;  %v1255_v54 = vadd.f32 %v2879_v26, %v1085_v50  ;;  %v2963_v13 = vpop.f32.mrf.mxu3  ;;  %v390_v35 = vld [vmem:[#allocation2 + $0x60] sm:$0xff]  ;;  %v423_v36 = vld [vmem:[#allocation2 + $0x168] sm:$0xff] }
  0xf9   : > { %v1008_v58 = vpop.f32.mrf.mxu0 }
  0xfa   : > { %2282 = vmatmul.msk.bf16.gmra.mxu1 %vm870_vm2, %v2095_v22  ;;  %v1652_v61 = vmax.f32 %v1588_v48, 0.0  ;;  %v1178_v62 = vadd.f32 %v2895_v11, %v1008_v58  ;;  %v1747_v63 = vpack.c.bf16 %v1683_v53, %v1683_v53  ;;  %v1353_v0 = vadd.f32 %v1255_v54, %v419_v49  ;;  %2299 = vmatmul.msk.bf16.gmra.mxu3 %vm870_vm2, %v2231_v31 }
  0xfb   : > { %v1484_v37 = vld [vmem:[#allocation2 + $0x140] sm:$0xff]  ;;  %v2219_v49 = vor.u32 %v2364_v39, %v2218_v38 }
  0xfc   : > { %v1716_v1 = vpack.c.bf16 %v1652_v61, %v1652_v61  ;;  %v1322_v4 = vadd.f32 %v1178_v62, %v388_v56  ;;  %1047 = vmatmul.bf16.gmra.mxu0 %v2083_v51  ;;  %1812 = vst.msk [vmem:[%s2767_s28 + $0x9c] sm:$0xf] %vm1772_vm4, %v1747_v63  ;;  %v1552_v5 = vmul.f32 %v2712_v9, %v1484_v37 }
  0xfd   : > { %v1453_v26 = vld [vmem:[#allocation2 + $0x48] sm:$0xff]  ;;  %1127 = vmatmul.bf16.gmra.mxu2 %v2211_v59  ;;  %1418 = vst.msk [vmem:[#allocation2 + $0x148] sm:$0xff] %vm313_vm3, %v1353_v0 }
  0xfe   : > { %1781 = vst.msk [vmem:[%s2767_s28 + $0x20] sm:$0xf] %vm1772_vm4, %v1716_v1  ;;  %v1521_v6 = vmul.f32 %v2712_v9, %v1453_v26  ;;  %v1620_v11 = vadd.f32 %v2733_v18, %v1552_v5  ;;  %v422_v1 = vld [vmem:[#allocation2 + $0x160] sm:$0xff] }
  0xff   : > { %v2957_v7 = vpop.f32.mrf.mxu1  ;;  %1387 = vst.msk [vmem:[#allocation2 + $0x50] sm:$0xff] %vm313_vm3, %v1322_v4  ;;  %v1088_v55 = vpop.f32.mrf.mxu2 }
 0x100   : > { %v1589_v20 = vadd.f32 %v2733_v18, %v1521_v6  ;;  %v1684_v14 = vmax.f32 %v1620_v11, 0.0  ;;  %v1258_v15 = vadd.f32 %v2902_v57, %v1088_v55  ;;  %v2103_v57 = vor.u32 %v2333_v19, %v2100_v21  ;;  %v2986_v45 = vpop.f32.mrf.mxu3  ;;  %v391_v6 = vld [vmem:[#allocation2 + $0x68] sm:$0xff]  ;;  %v2335_v55 = vld [vmem:[%s2506_s7 + $0x104] sm:$0xf] }
 0x101   : > { %v1010_v41 = vpop.f32.mrf.mxu0 }
 0x102   : > { %v1653_v60 = vmax.f32 %v1589_v20, 0.0  ;;  %v1180_v23 = vadd.f32 %v2911_v12, %v1010_v41  ;;  %v1748_v27 = vpack.c.bf16 %v1684_v14, %v1684_v14  ;;  %v1354_v29 = vadd.f32 %v1258_v15, %v420_v8  ;;  %v2108_v14 = vld [vmem:[%s2506_s7 + $0x108] sm:$0xf0] }
 0x103   : > { %v2111_v24 = vor.u32 %v2335_v55, %v2108_v14 }
 0x104   : > { %v1717_v32 = vpack.c.bf16 %v1653_v60, %v1653_v60  ;;  %v1323_v33 = vadd.f32 %v1180_v23, %v389_v16  ;;  %1813 = vst.msk [vmem:[%s2767_s28 + $0xa0] sm:$0xf] %vm1772_vm4, %v1748_v27  ;;  %v1485_v3 = vld [vmem:[#allocation2 + $0x148] sm:$0xff] }
 0x105   : > { %v1553_v40 = vmul.f32 %v2712_v9, %v1485_v3  ;;  %1419 = vst.msk [vmem:[#allocation2 + $0x150] sm:$0xff] %vm313_vm3, %v1354_v29 }
 0x106   : > { %1782 = vst.msk [vmem:[%s2767_s28 + $0x24] sm:$0xf] %vm1772_vm4, %v1717_v32  ;;  %v1454_v42 = vld [vmem:[#allocation2 + $0x50] sm:$0xff] }
 0x107   : > { %v2979_v12 = vpop.f32.mrf.mxu1  ;;  %v1522_v22 = vmul.f32 %v2712_v9, %v1454_v42  ;;  %1388 = vst.msk [vmem:[#allocation2 + $0x58] sm:$0xff] %vm313_vm3, %v1323_v33  ;;  %v1090_v43 = vpop.f32.mrf.mxu2  ;;  %v1621_v2 = vadd.f32 %v2733_v18, %v1553_v40  ;;  %v2226_v32 = vld [vmem:[%s2506_s7 + $0x1f0] sm:$0xf]  ;;  %v2366_v33 = vld [vmem:[%s2506_s7 + $0x1f4] sm:$0xf0] }
 0x108   : > { %v1260_v47 = vadd.f32 %v2919_v17, %v1090_v43  ;;  %v3003_v4 = vpop.f32.mrf.mxu3  ;;  %v2227_v43 = vor.u32 %v2366_v33, %v2226_v32 }
 0x109   : > { %v1013_v48 = vpop.f32.mrf.mxu0  ;;  %v1590_v50 = vadd.f32 %v2733_v18, %v1522_v22  ;;  %v1685_v53 = vmax.f32 %v1621_v2, 0.0  ;;  %v392_v22 = vld [vmem:[#allocation2 + $0x70] sm:$0xff] }
 0x10a   : > { %2283 = vmatmul.msk.bf16.gmra.mxu1 %vm870_vm2, %v2103_v57  ;;  %v1183_v51 = vadd.f32 %v2936_v46, %v1013_v48  ;;  %v1355_v54 = vadd.f32 %v1260_v47, %v421_v30 }
 0x10b   : > { %v1654_v56 = vmax.f32 %v1590_v50, 0.0  ;;  %v1749_v59 = vpack.c.bf16 %v1685_v53, %v1685_v53 }
 0x10c   : > { %v1324_v58 = vadd.f32 %v1183_v51, %v390_v35  ;;  %1052 = vmatmul.bf16.gmra.mxu0 %v2091_v44  ;;  %1420 = vst.msk [vmem:[#allocation2 + $0x158] sm:$0xff] %vm313_vm3, %v1355_v54  ;;  %v1486_v61 = vld [vmem:[#allocation2 + $0x150] sm:$0xff] }
 0x10d   : > { %1132 = vmatmul.bf16.gmra.mxu2 %v2219_v49  ;;  %v1718_v17 = vpack.c.bf16 %v1654_v56, %v1654_v56  ;;  %1814 = vst.msk [vmem:[%s2767_s28 + $0xa4] sm:$0xf] %vm1772_vm4, %v1749_v59  ;;  %v1554_v46 = vmul.f32 %v2712_v9, %v1486_v61 }
 0x10e   : > { %1389 = vst.msk [vmem:[#allocation2 + $0x60] sm:$0xff] %vm313_vm3, %v1324_v58  ;;  %v1455_v63 = vld [vmem:[#allocation2 + $0x58] sm:$0xff]  ;;  %v424_v58 = vld [vmem:[#allocation2 + $0x170] sm:$0xff] }
 0x10f   : > { %v2995_v62 = vpop.f32.mrf.mxu1  ;;  %1783 = vst.msk [vmem:[%s2767_s28 + $0x28] sm:$0xf] %vm1772_vm4, %v1718_v17  ;;  %v1523_v0 = vmul.f32 %v2712_v9, %v1455_v63  ;;  %v1093_v37 = vpop.f32.mrf.mxu2  ;;  %v1622_v5 = vadd.f32 %v2733_v18, %v1554_v46  ;;  %v393_v63 = vld [vmem:[#allocation2 + $0x78] sm:$0xff] }
 0x110   : > { %v1263_v26 = vadd.f32 %v2946_v52, %v1093_v37  ;;  %v3027_v39 = vpop.f32.mrf.mxu3 }
 0x111   : > { %v1015_v11 = vpop.f32.mrf.mxu0  ;;  %v1591_v20 = vadd.f32 %v2733_v18, %v1523_v0  ;;  %v1686_v15 = vmax.f32 %v1622_v5, 0.0 }
 0x112   : > { %v1185_v8 = vadd.f32 %v2957_v7, %v1015_v11  ;;  %v1356_v16 = vadd.f32 %v1263_v26, %v422_v1  ;;  %v2334_v7 = vld [vmem:[%s2506_s7 + $0xf4] sm:$0xf0] }
 0x113   : > { %v1655_v41 = vmax.f32 %v1591_v20, 0.0  ;;  %v1487_v19 = vld [vmem:[#allocation2 + $0x158] sm:$0xff]  ;;  %v1750_v52 = vpack.c.bf16 %v1686_v15, %v1686_v15  ;;  %v2099_v3 = vor.u32 %v2334_v7, %v2098_v25 }
 0x114   : > { %v1325_v21 = vadd.f32 %v1185_v8, %v391_v6  ;;  %v1555_v60 = vmul.f32 %v2712_v9, %v1487_v19  ;;  %1421 = vst.msk [vmem:[#allocation2 + $0x160] sm:$0xff] %vm313_vm3, %v1356_v16 }
 0x115   : > { %v1456_v23 = vld [vmem:[#allocation2 + $0x60] sm:$0xff]  ;;  %v1719_v27 = vpack.c.bf16 %v1655_v41, %v1655_v41  ;;  %1815 = vst.msk [vmem:[%s2767_s28 + $0xa8] sm:$0xf] %vm1772_vm4, %v1750_v52 }
 0x116   : > { %v1524_v29 = vmul.f32 %v2712_v9, %v1456_v23  ;;  %1390 = vst.msk [vmem:[#allocation2 + $0x68] sm:$0xff] %vm313_vm3, %v1325_v21  ;;  %v1623_v34 = vadd.f32 %v2733_v18, %v1555_v60  ;;  %v394_v21 = vld [vmem:[#allocation2 + $0x80] sm:$0xff] }
 0x117   : > { %v3017_v31 = vpop.f32.mrf.mxu1  ;;  %1784 = vst.msk [vmem:[%s2767_s28 + $0x2c] sm:$0xf] %vm1772_vm4, %v1719_v27  ;;  %v1095_v38 = vpop.f32.mrf.mxu2 }
 0x118   : > { %v1592_v57 = vadd.f32 %v2733_v18, %v1524_v29  ;;  %v1687_v40 = vmax.f32 %v1623_v34, 0.0  ;;  %v1265_v42 = vadd.f32 %v2963_v13, %v1095_v38  ;;  %v3042_v17 = vpop.f32.mrf.mxu3 }
 0x119   : > { %v1018_v30 = vpop.f32.mrf.mxu0 }
 0x11a   : > { %2284 = vmatmul.msk.bf16.gmra.mxu1 %vm870_vm2, %v2111_v24  ;;  %v1656_v44 = vmax.f32 %v1592_v57, 0.0  ;;  %v1188_v2 = vadd.f32 %v2979_v12, %v1018_v30  ;;  %v1751_v47 = vpack.c.bf16 %v1687_v40, %v1687_v40  ;;  %v1357_v35 = vadd.f32 %v1265_v42, %v423_v36  ;;  %v426_v36 = vld [vmem:[#allocation2 + $0x180] sm:$0xff] }
 0x11b   : > { %v1488_v49 = vld [vmem:[#allocation2 + $0x160] sm:$0xff] }
 0x11c   : > { %v1720_v48 = vpack.c.bf16 %v1656_v44, %v1656_v44  ;;  %v1326_v50 = vadd.f32 %v1188_v2, %v392_v22  ;;  %1057 = vmatmul.bf16.gmra.mxu0 %v2099_v3  ;;  %1816 = vst.msk [vmem:[%s2767_s28 + $0xac] sm:$0xf] %vm1772_vm4, %v1751_v47  ;;  %v1556_v51 = vmul.f32 %v2712_v9, %v1488_v49  ;;  %v395_v22 = vld [vmem:[#allocation2 + $0x88] sm:$0xff] }
 0x11d   : > { %v1457_v13 = vld [vmem:[#allocation2 + $0x68] sm:$0xff]  ;;  %1137 = vmatmul.bf16.gmra.mxu2 %v2227_v43  ;;  %1422 = vst.msk [vmem:[#allocation2 + $0x168] sm:$0xff] %vm313_vm3, %v1357_v35 }
 0x11e   : > { %1785 = vst.msk [vmem:[%s2767_s28 + $0x30] sm:$0xf] %vm1772_vm4, %v1720_v48  ;;  %v1525_v53 = vmul.f32 %v2712_v9, %v1457_v13  ;;  %v1624_v56 = vadd.f32 %v2733_v18, %v1556_v51 }
 0x11f   : > { %v1194_v54 = vpop.f32.mrf.mxu1  ;;  %1391 = vst.msk [vmem:[#allocation2 + $0x70] sm:$0xff] %vm313_vm3, %v1326_v50  ;;  %v1098_v59 = vpop.f32.mrf.mxu2 }
 0x120   : > { %v1593_v12 = vadd.f32 %v2733_v18, %v1525_v53  ;;  %v1688_v61 = vmax.f32 %v1624_v56, 0.0  ;;  %v1268_v46 = vadd.f32 %v2986_v45, %v1098_v59  ;;  %v3056_v16 = vpop.f32.mrf.mxu3 }
 0x121   : > { %v1020_v0 = vpop.f32.mrf.mxu0 }
 0x122   : > { %v1657_v1 = vmax.f32 %v1593_v12, 0.0  ;;  %v1190_v37 = vadd.f32 %v2995_v62, %v1020_v0  ;;  %v1752_v5 = vpack.c.bf16 %v1688_v61, %v1688_v61  ;;  %v1358_v26 = vadd.f32 %v1268_v46, %v424_v58  ;;  %v425_v62 = vld [vmem:[#allocation2 + $0x178] sm:$0xff]  ;;  %v427_v58 = vld [vmem:[#allocation2 + $0x188] sm:$0xff] }
 0x124   : > { %v1721_v6 = vpack.c.bf16 %v1657_v1, %v1657_v1  ;;  %v1327_v11 = vadd.f32 %v1190_v37, %v393_v63  ;;  %1817 = vst.msk [vmem:[%s2767_s28 + $0xb0] sm:$0xf] %vm1772_vm4, %v1752_v5  ;;  %v1489_v20 = vld [vmem:[#allocation2 + $0x168] sm:$0xff]  ;;  %v396_v63 = vld [vmem:[#allocation2 + $0x90] sm:$0xff] }
 0x125   : > { %v1557_v55 = vmul.f32 %v2712_v9, %v1489_v20  ;;  %1423 = vst.msk [vmem:[#allocation2 + $0x170] sm:$0xff] %vm313_vm3, %v1358_v26 }
 0x126   : > { %1786 = vst.msk [vmem:[%s2767_s28 + $0x34] sm:$0xf] %vm1772_vm4, %v1721_v6  ;;  %v1458_v14 = vld [vmem:[#allocation2 + $0x70] sm:$0xff] }
 0x127   : > { %v3050_v8 = vpop.f32.mrf.mxu1  ;;  %v1526_v45 = vmul.f32 %v2712_v9, %v1458_v14  ;;  %1392 = vst.msk [vmem:[#allocation2 + $0x78] sm:$0xff] %vm313_vm3, %v1327_v11  ;;  %v1100_v15 = vpop.f32.mrf.mxu2  ;;  %v1625_v41 = vadd.f32 %v2733_v18, %v1557_v55 }
 0x128   : > { %v1270_v19 = vadd.f32 %v3003_v4, %v1100_v15  ;;  %v3072_v3 = vpop.f32.mrf.mxu3 }
 0x129   : > { %v1023_v52 = vpop.f32.mrf.mxu0  ;;  %v1594_v60 = vadd.f32 %v2733_v18, %v1526_v45  ;;  %v1689_v24 = vmax.f32 %v1625_v41, 0.0  ;;  %v3105_v45 = vld [vmem:[%s3307_s3] ss:$0 sm:$0xff]  ;;  %v428_v41 = vld [vmem:[#allocation2 + $0x190] sm:$0xff] }
 0x12a   : > { %v1193_v23 = vadd.f32 %v3017_v31, %v1023_v52  ;;  %v1359_v25 = vadd.f32 %v1270_v19, %v425_v62 }
 0x12b   : > { %v1658_v7 = vmax.f32 %v1594_v60, 0.0  ;;  %v1753_v29 = vpack.c.bf16 %v1689_v24, %v1689_v24  ;;  %v397_v60 = vld [vmem:[#allocation2 + $0x98] sm:$0xff] }
 0x12c   : > { %v1328_v27 = vadd.f32 %v1193_v23, %v394_v21  ;;  %1424 = vst.msk [vmem:[#allocation2 + $0x178] sm:$0xff] %vm313_vm3, %v1359_v25  ;;  %v1490_v33 = vld [vmem:[#allocation2 + $0x170] sm:$0xff] }
 0x12d   : > { %v1722_v32 = vpack.c.bf16 %v1658_v7, %v1658_v7  ;;  %1818 = vst.msk [vmem:[%s2767_s28 + $0xb4] sm:$0xf] %vm1772_vm4, %v1753_v29  ;;  %v1558_v4 = vmul.f32 %v2712_v9, %v1490_v33 }
 0x12e   : > { %1393 = vst.msk [vmem:[#allocation2 + $0x80] sm:$0xff] %vm313_vm3, %v1328_v27  ;;  %v1459_v57 = vld [vmem:[#allocation2 + $0x78] sm:$0xff] }
 0x12f   : > { %v3064_v34 = vpop.f32.mrf.mxu1  ;;  %1787 = vst.msk [vmem:[%s2767_s28 + $0x38] sm:$0xf] %vm1772_vm4, %v1722_v32  ;;  %v1527_v31 = vmul.f32 %v2712_v9, %v1459_v57  ;;  %v1103_v38 = vpop.f32.mrf.mxu2  ;;  %v1626_v40 = vadd.f32 %v2733_v18, %v1558_v4 }
 0x130   : > { %v1273_v42 = vadd.f32 %v3027_v39, %v1103_v38  ;;  %v3089_v37 = vpop.f32.mrf.mxu3 }
 0x131   : > { %v1025_v30 = vpop.f32.mrf.mxu0  ;;  %v1595_v43 = vadd.f32 %v2733_v18, %v1527_v31  ;;  %v1690_v2 = vmax.f32 %v1626_v40, 0.0 }
 0x132   : > { %v1195_v44 = vadd.f32 %v1194_v54, %v1025_v30  ;;  %v1360_v47 = vadd.f32 %v1273_v42, %v426_v36  ;;  %v429_v36 = vld [vmem:[#allocation2 + $0x198] sm:$0xff] }
 0x133   : > { %v1659_v35 = vmax.f32 %v1595_v43, 0.0  ;;  %v1491_v48 = vld [vmem:[#allocation2 + $0x178] sm:$0xff]  ;;  %v1754_v50 = vpack.c.bf16 %v1690_v2, %v1690_v2 }
 0x134   : > { %v1329_v49 = vadd.f32 %v1195_v44, %v395_v22  ;;  %v1559_v51 = vmul.f32 %v2712_v9, %v1491_v48  ;;  %1425 = vst.msk [vmem:[#allocation2 + $0x180] sm:$0xff] %vm313_vm3, %v1360_v47  ;;  %v398_v22 = vld [vmem:[#allocation2 + $0xa0] sm:$0xff] }
 0x135   : > { %v1460_v13 = vld [vmem:[#allocation2 + $0x80] sm:$0xff]  ;;  %v1723_v53 = vpack.c.bf16 %v1659_v35, %v1659_v35  ;;  %1819 = vst.msk [vmem:[%s2767_s28 + $0xb8] sm:$0xf] %vm1772_vm4, %v1754_v50 }
 0x136   : > { %v1528_v39 = vmul.f32 %v2712_v9, %v1460_v13  ;;  %1394 = vst.msk [vmem:[#allocation2 + $0x88] sm:$0xff] %vm313_vm3, %v1329_v49  ;;  %v1627_v54 = vadd.f32 %v2733_v18, %v1559_v51 }
 0x137   : > { %v1202_v56 = vpop.f32.mrf.mxu1  ;;  %1788 = vst.msk [vmem:[%s2767_s28 + $0x3c] sm:$0xf] %vm1772_vm4, %v1723_v53  ;;  %v1105_v59 = vpop.f32.mrf.mxu2 }
 0x138   : > { %v1596_v12 = vadd.f32 %v2733_v18, %v1528_v39  ;;  %v1691_v61 = vmax.f32 %v1627_v54, 0.0  ;;  %v1275_v46 = vadd.f32 %v3042_v17, %v1105_v59  ;;  %v3096_v18 = vld [vmem:[%s3306_s2] ss:$0 sm:$0xff]  ;;  %v3113_v33 = vpop.f32.mrf.mxu3 }
 0x139   : > { %v1028_v9 = vpop.f32.mrf.mxu0  ;;  %v430_v54 = vld [vmem:[#allocation2 + $0x1a0] sm:$0xff] }
 0x13a   : > { %v1660_v0 = vmax.f32 %v1596_v12, 0.0  ;;  %v1198_v1 = vadd.f32 %v3050_v8, %v1028_v9  ;;  %v1755_v5 = vpack.c.bf16 %v1691_v61, %v1691_v61  ;;  %v1361_v26 = vadd.f32 %v1275_v46, %v427_v58  ;;  %v399_v61 = vld [vmem:[#allocation2 + $0xa8] sm:$0xff] }
 0x13b   : > { %v1492_v11 = vld [vmem:[#allocation2 + $0x180] sm:$0xff] }
 0x13c   : > { %v1724_v6 = vpack.c.bf16 %v1660_v0, %v1660_v0  ;;  %v1330_v20 = vadd.f32 %v1198_v1, %v396_v63  ;;  %1820 = vst.msk [vmem:[%s2767_s28 + $0xbc] sm:$0xf] %vm1772_vm4, %v1755_v5  ;;  %v1560_v17 = vmul.f32 %v3096_v18, %v1492_v11 }
 0x13d   : > { %v1461_v55 = vld [vmem:[#allocation2 + $0x88] sm:$0xff]  ;;  %1426 = vst.msk [vmem:[#allocation2 + $0x188] sm:$0xff] %vm313_vm3, %v1361_v26 }
 0x13e   : > { %1789 = vst.msk [vmem:[%s2767_s28 + $0x40] sm:$0xf] %vm1772_vm4, %v1724_v6  ;;  %v1529_v8 = vmul.f32 %v3096_v18, %v1461_v55  ;;  %v1628_v62 = vadd.f32 %v3105_v45, %v1560_v17 }
 0x13f   : > { %v1204_v14 = vpop.f32.mrf.mxu1  ;;  %1395 = vst.msk [vmem:[#allocation2 + $0x90] sm:$0xff] %vm313_vm3, %v1330_v20  ;;  %v1108_v19 = vpop.f32.mrf.mxu2 }
 0x140   : > { %v1597_v15 = vadd.f32 %v3105_v45, %v1529_v8  ;;  %v1692_v21 = vmax.f32 %v1628_v62, 0.0  ;;  %v1278_v52 = vadd.f32 %v3056_v16, %v1108_v19 }
 0x141   : > { %v1030_v23 = vpop.f32.mrf.mxu0 }
 0x142   : > { %v1661_v24 = vmax.f32 %v1597_v15, 0.0  ;;  %v1200_v25 = vadd.f32 %v3064_v34, %v1030_v23  ;;  %v1756_v7 = vpack.c.bf16 %v1692_v21, %v1692_v21  ;;  %v1362_v27 = vadd.f32 %v1278_v52, %v428_v41  ;;  %v431_v15 = vld [vmem:[#allocation2 + $0x1a8] sm:$0xff] }
 0x144   : > { %v1725_v29 = vpack.c.bf16 %v1661_v24, %v1661_v24  ;;  %v1331_v32 = vadd.f32 %v1200_v25, %v397_v60  ;;  %1821 = vst.msk [vmem:[%s2767_s28 + $0xc0] sm:$0xf] %vm1772_vm4, %v1756_v7  ;;  %v1493_v4 = vld [vmem:[#allocation2 + $0x188] sm:$0xff]  ;;  %v400_v60 = vld [vmem:[#allocation2 + $0xb0] sm:$0xff] }
 0x145   : > { %v1561_v16 = vmul.f32 %v3096_v18, %v1493_v4  ;;  %1427 = vst.msk [vmem:[#allocation2 + $0x190] sm:$0xff] %vm313_vm3, %v1362_v27 }
 0x146   : > { %1790 = vst.msk [vmem:[%s2767_s28 + $0x44] sm:$0xf] %vm1772_vm4, %v1725_v29  ;;  %v1462_v31 = vld [vmem:[#allocation2 + $0x90] sm:$0xff] }
 0x147   : > { %v3119_v57 = vpop.f32.mrf.mxu1  ;;  %v1530_v34 = vmul.f32 %v3096_v18, %v1462_v31  ;;  %1396 = vst.msk [vmem:[#allocation2 + $0x98] sm:$0xff] %vm313_vm3, %v1331_v32  ;;  %v1110_v38 = vpop.f32.mrf.mxu2  ;;  %v1629_v40 = vadd.f32 %v3105_v45, %v1561_v16 }
 0x148   : > { %v1280_v42 = vadd.f32 %v3072_v3, %v1110_v38  ;;  %v1287_v3 = vpop.f32.mrf.mxu3  ;;  %v432_v38 = vld [vmem:[#allocation2 + $0x1b0] sm:$0xff] }
 0x149   : > { %v1033_v30 = vpop.f32.mrf.mxu0  ;;  %v1598_v43 = vadd.f32 %v3105_v45, %v1530_v34  ;;  %v1693_v2 = vmax.f32 %v1629_v40, 0.0 }
 0x14a   : > { %v1203_v44 = vadd.f32 %v1202_v56, %v1033_v30  ;;  %v1363_v47 = vadd.f32 %v1280_v42, %v429_v36  ;;  %v401_v30 = vld [vmem:[#allocation2 + $0xb8] sm:$0xff] }
 0x14b   : > { %v1662_v35 = vmax.f32 %v1598_v43, 0.0  ;;  %v1757_v49 = vpack.c.bf16 %v1693_v2, %v1693_v2 }
 0x14c   : > { %v1332_v48 = vadd.f32 %v1203_v44, %v398_v22  ;;  %1428 = vst.msk [vmem:[#allocation2 + $0x198] sm:$0xff] %vm313_vm3, %v1363_v47  ;;  %v1494_v51 = vld [vmem:[#allocation2 + $0x190] sm:$0xff] }
 0x14d   : > { %v1726_v50 = vpack.c.bf16 %v1662_v35, %v1662_v35  ;;  %1822 = vst.msk [vmem:[%s2767_s28 + $0xc4] sm:$0xf] %vm1772_vm4, %v1757_v49  ;;  %v1562_v53 = vmul.f32 %v3096_v18, %v1494_v51 }
 0x14e   : > { %1397 = vst.msk [vmem:[#allocation2 + $0xa0] sm:$0xff] %vm313_vm3, %v1332_v48  ;;  %v1463_v39 = vld [vmem:[#allocation2 + $0x98] sm:$0xff] }
 0x14f   : > { %v3130_v13 = vpop.f32.mrf.mxu1  ;;  %1791 = vst.msk [vmem:[%s2767_s28 + $0x48] sm:$0xf] %vm1772_vm4, %v1726_v50  ;;  %v1531_v56 = vmul.f32 %v3096_v18, %v1463_v39  ;;  %v1113_v12 = vpop.f32.mrf.mxu2  ;;  %v1630_v58 = vadd.f32 %v3105_v45, %v1562_v53 }
 0x150   : > { %v1283_v59 = vadd.f32 %v3089_v37, %v1113_v12  ;;  %v1289_v19 = vpop.f32.mrf.mxu3 }
 0x151   : > { %v1035_v46 = vpop.f32.mrf.mxu0  ;;  %v1599_v63 = vadd.f32 %v3105_v45, %v1531_v56  ;;  %v1694_v0 = vmax.f32 %v1630_v58, 0.0 }
 0x152   : > { %v1205_v9 = vadd.f32 %v1204_v14, %v1035_v46  ;;  %v1364_v1 = vadd.f32 %v1283_v59, %v430_v54  ;;  %v402_v59 = vld [vmem:[#allocation2 + $0xc0] sm:$0xff] }
 0x153   : > { %v1663_v5 = vmax.f32 %v1599_v63, 0.0  ;;  %v1495_v26 = vld [vmem:[#allocation2 + $0x198] sm:$0xff]  ;;  %v1758_v11 = vpack.c.bf16 %v1694_v0, %v1694_v0 }
 0x154   : > { %v1333_v6 = vadd.f32 %v1205_v9, %v399_v61  ;;  %v1563_v20 = vmul.f32 %v3096_v18, %v1495_v26  ;;  %1429 = vst.msk [vmem:[#allocation2 + $0x1a0] sm:$0xff] %vm313_vm3, %v1364_v1 }
 0x155   : > { %v1464_v17 = vld [vmem:[#allocation2 + $0xa0] sm:$0xff]  ;;  %v1727_v55 = vpack.c.bf16 %v1663_v5, %v1663_v5  ;;  %1823 = vst.msk [vmem:[%s2767_s28 + $0xc8] sm:$0xf] %vm1772_vm4, %v1758_v11 }
 0x156   : > { %v1532_v37 = vmul.f32 %v3096_v18, %v1464_v17  ;;  %1398 = vst.msk [vmem:[#allocation2 + $0xa8] sm:$0xff] %vm313_vm3, %v1333_v6  ;;  %v1631_v14 = vadd.f32 %v3105_v45, %v1563_v20 }
 0x157   : > { %v1212_v8 = vpop.f32.mrf.mxu1  ;;  %1792 = vst.msk [vmem:[%s2767_s28 + $0x4c] sm:$0xf] %vm1772_vm4, %v1727_v55  ;;  %v1115_v41 = vpop.f32.mrf.mxu2 }
 0x158   : > { %v1600_v62 = vadd.f32 %v3105_v45, %v1532_v37  ;;  %v1695_v21 = vmax.f32 %v1631_v14, 0.0  ;;  %v1285_v52 = vadd.f32 %v3113_v33, %v1115_v41  ;;  %v1292_v47 = vpop.f32.mrf.mxu3  ;;  %v434_v14 = vld [vmem:[#allocation2 + $0x1c0] sm:$0xff] }
 0x159   : > { %v1038_v23 = vpop.f32.mrf.mxu0 }
 0x15a   : > { %v1664_v24 = vmax.f32 %v1600_v62, 0.0  ;;  %v1208_v25 = vadd.f32 %v3119_v57, %v1038_v23  ;;  %v1759_v7 = vpack.c.bf16 %v1695_v21, %v1695_v21  ;;  %v1365_v27 = vadd.f32 %v1285_v52, %v431_v15 }
 0x15b   : > { %v1496_v32 = vld [vmem:[#allocation2 + $0x1a0] sm:$0xff] }
 0x15c   : > { %v1728_v29 = vpack.c.bf16 %v1664_v24, %v1664_v24  ;;  %v1334_v4 = vadd.f32 %v1208_v25, %v400_v60  ;;  %1824 = vst.msk [vmem:[%s2767_s28 + $0xcc] sm:$0xf] %vm1772_vm4, %v1759_v7  ;;  %v1564_v16 = vmul.f32 %v3096_v18, %v1496_v32 }
 0x15d   : > { %v1465_v31 = vld [vmem:[#allocation2 + $0xa8] sm:$0xff]  ;;  %1430 = vst.msk [vmem:[#allocation2 + $0x1a8] sm:$0xff] %vm313_vm3, %v1365_v27 }
 0x15e   : > { %1793 = vst.msk [vmem:[%s2767_s28 + $0x50] sm:$0xf] %vm1772_vm4, %v1728_v29  ;;  %v1533_v34 = vmul.f32 %v3096_v18, %v1465_v31  ;;  %v1632_v36 = vadd.f32 %v3105_v45, %v1564_v16 }
 0x15f   : > { %v1214_v33 = vpop.f32.mrf.mxu1  ;;  %1399 = vst.msk [vmem:[#allocation2 + $0xb0] sm:$0xff] %vm313_vm3, %v1334_v4 }
 0x160   : > { %v1601_v57 = vadd.f32 %v3105_v45, %v1533_v34  ;;  %v1118_v40 = vpop.f32.mrf.mxu2  ;;  %v1696_v42 = vmax.f32 %v1632_v36, 0.0  ;;  %v1294_v26 = vpop.f32.mrf.mxu3 }
 0x161   : > { %v1288_v22 = vadd.f32 %v1287_v3, %v1118_v40  ;;  %v1040_v43 = vpop.f32.mrf.mxu0 }
 0x162   : > { %v1665_v44 = vmax.f32 %v1601_v57, 0.0  ;;  %v1210_v2 = vadd.f32 %v3130_v13, %v1040_v43  ;;  %v1760_v35 = vpack.c.bf16 %v1696_v42, %v1696_v42  ;;  %v433_v13 = vld [vmem:[#allocation2 + $0x1b8] sm:$0xff] }
 0x163   : > { %v1366_v48 = vadd.f32 %v1288_v22, %v432_v38  ;;  %v435_v38 = vld [vmem:[#allocation2 + $0x1c8] sm:$0xff] }
 0x164   : > { %v1729_v49 = vpack.c.bf16 %v1665_v44, %v1665_v44  ;;  %v1335_v50 = vadd.f32 %v1210_v2, %v401_v30  ;;  %1825 = vst.msk [vmem:[%s2767_s28 + $0xd0] sm:$0xf] %vm1772_vm4, %v1760_v35  ;;  %v1497_v51 = vld [vmem:[#allocation2 + $0x1a8] sm:$0xff]  ;;  %v404_v30 = vld [vmem:[#allocation2 + $0xd0] sm:$0xff] }
 0x165   : > { %v1565_v39 = vmul.f32 %v3096_v18, %v1497_v51  ;;  %1431 = vst.msk [vmem:[#allocation2 + $0x1b0] sm:$0xff] %vm313_vm3, %v1366_v48 }
 0x166   : > { %1794 = vst.msk [vmem:[%s2767_s28 + $0x54] sm:$0xf] %vm1772_vm4, %v1729_v49  ;;  %v1466_v3 = vld [vmem:[#allocation2 + $0xb0] sm:$0xff] }
 0x167   : > { %v3168_v53 = vpop.f32.mrf.mxu1  ;;  %v1534_v56 = vmul.f32 %v3096_v18, %v1466_v3  ;;  %1400 = vst.msk [vmem:[#allocation2 + $0xb8] sm:$0xff] %vm313_vm3, %v1335_v50  ;;  %v1633_v12 = vadd.f32 %v3105_v45, %v1565_v39 }
 0x168   : > { %v1120_v54 = vpop.f32.mrf.mxu2  ;;  %v1297_v36 = vpop.f32.mrf.mxu3 }
 0x169   : > { %v1290_v58 = vadd.f32 %v1289_v19, %v1120_v54  ;;  %v1043_v61 = vpop.f32.mrf.mxu0  ;;  %v1602_v46 = vadd.f32 %v3105_v45, %v1534_v56  ;;  %v1697_v9 = vmax.f32 %v1633_v12, 0.0  ;;  %v403_v19 = vld [vmem:[#allocation2 + $0xc8] sm:$0xff]  ;;  %v436_v54 = vld [vmem:[#allocation2 + $0x1d0] sm:$0xff] }
 0x16a   : > { %v1213_v63 = vadd.f32 %v1212_v8, %v1043_v61 }
 0x16b   : > { %v1367_v0 = vadd.f32 %v1290_v58, %v433_v13  ;;  %v1666_v1 = vmax.f32 %v1602_v46, 0.0  ;;  %v1761_v6 = vpack.c.bf16 %v1697_v9, %v1697_v9  ;;  %v405_v46 = vld [vmem:[#allocation2 + $0xd8] sm:$0xff] }
 0x16c   : > { %v1336_v5 = vadd.f32 %v1213_v63, %v402_v59  ;;  %v1498_v20 = vld [vmem:[#allocation2 + $0x1b0] sm:$0xff] }
 0x16d   : > { %1432 = vst.msk [vmem:[#allocation2 + $0x1b8] sm:$0xff] %vm313_vm3, %v1367_v0  ;;  %v1730_v11 = vpack.c.bf16 %v1666_v1, %v1666_v1  ;;  %v1566_v55 = vmul.f32 %v3096_v18, %v1498_v20 }
 0x16e   : > { %1401 = vst.msk [vmem:[#allocation2 + $0xc0] sm:$0xff] %vm313_vm3, %v1336_v5  ;;  %v1467_v37 = vld [vmem:[#allocation2 + $0xb8] sm:$0xff] }
 0x16f   : > { %v3178_v17 = vpop.f32.mrf.mxu1  ;;  %1826 = vst.msk [vmem:[%s2767_s28 + $0xd4] sm:$0xf] %vm1772_vm4, %v1761_v6  ;;  %v1535_v8 = vmul.f32 %v3096_v18, %v1467_v37  ;;  %v1634_v15 = vadd.f32 %v3105_v45, %v1566_v55 }
 0x170   : > { %1795 = vst.msk [vmem:[%s2767_s28 + $0x58] sm:$0xf] %vm1772_vm4, %v1730_v11  ;;  %v1123_v62 = vpop.f32.mrf.mxu2  ;;  %v1299_v58 = vpop.f32.mrf.mxu3 }
 0x171   : > { %v1293_v41 = vadd.f32 %v1292_v47, %v1123_v62  ;;  %v1045_v21 = vpop.f32.mrf.mxu0  ;;  %v1603_v52 = vadd.f32 %v3105_v45, %v1535_v8  ;;  %v1698_v23 = vmax.f32 %v1634_v15, 0.0 }
 0x172   : > { %v1215_v60 = vadd.f32 %v1214_v33, %v1045_v21 }
 0x173   : > { %v1368_v24 = vadd.f32 %v1293_v41, %v434_v14  ;;  %v1667_v25 = vmax.f32 %v1603_v52, 0.0  ;;  %v1762_v29 = vpack.c.bf16 %v1698_v23, %v1698_v23  ;;  %v406_v41 = vld [vmem:[#allocation2 + $0xe0] sm:$0xff] }
 0x174   : > { %v1499_v7 = vld [vmem:[#allocation2 + $0x1b8] sm:$0xff]  ;;  %v1337_v27 = vadd.f32 %v1215_v60, %v403_v19 }
 0x175   : > { %v1567_v32 = vmul.f32 %v3096_v18, %v1499_v7  ;;  %v1468_v4 = vld [vmem:[#allocation2 + $0xc0] sm:$0xff]  ;;  %1433 = vst.msk [vmem:[#allocation2 + $0x1c0] sm:$0xff] %vm313_vm3, %v1368_v24  ;;  %v1731_v16 = vpack.c.bf16 %v1667_v25, %v1667_v25 }
 0x176   : > { %v1536_v31 = vmul.f32 %v3096_v18, %v1468_v4  ;;  %1402 = vst.msk [vmem:[#allocation2 + $0xc8] sm:$0xff] %vm313_vm3, %v1337_v27 }
 0x177   : > { %v1222_v34 = vpop.f32.mrf.mxu1  ;;  %1827 = vst.msk [vmem:[%s2767_s28 + $0xd8] sm:$0xf] %vm1772_vm4, %v1762_v29  ;;  %v1635_v33 = vadd.f32 %v3105_v45, %v1567_v32 }
 0x178   : > { %1796 = vst.msk [vmem:[%s2767_s28 + $0x5c] sm:$0xf] %vm1772_vm4, %v1731_v16  ;;  %v1604_v57 = vadd.f32 %v3105_v45, %v1536_v31  ;;  %v1125_v40 = vpop.f32.mrf.mxu2  ;;  %v1302_v52 = vpop.f32.mrf.mxu3 }
 0x179   : > { %v1699_v42 = vmax.f32 %v1635_v33, 0.0  ;;  %v1295_v22 = vadd.f32 %v1294_v26, %v1125_v40  ;;  %v1048_v43 = vpop.f32.mrf.mxu0  ;;  %v407_v40 = vld [vmem:[#allocation2 + $0xe8] sm:$0xff] }
 0x17a   : > { %v1668_v44 = vmax.f32 %v1604_v57, 0.0  ;;  %v1218_v2 = vadd.f32 %v3168_v53, %v1048_v43 }
 0x17b   : > { %v1763_v47 = vpack.c.bf16 %v1699_v42, %v1699_v42  ;;  %v1369_v35 = vadd.f32 %v1295_v22, %v435_v38 }
 0x17c   : > { %v1732_v48 = vpack.c.bf16 %v1668_v44, %v1668_v44  ;;  %v1500_v49 = vld [vmem:[#allocation2 + $0x1c0] sm:$0xff]  ;;  %v1338_v50 = vadd.f32 %v1218_v2, %v404_v30 }
 0x17d   : > { %1828 = vst.msk [vmem:[%s2767_s28 + $0xdc] sm:$0xf] %vm1772_vm4, %v1763_v47  ;;  %v1568_v51 = vmul.f32 %v3096_v18, %v1500_v49  ;;  %v1469_v39 = vld [vmem:[#allocation2 + $0xc8] sm:$0xff] }
 0x17e   : > { %1797 = vst.msk [vmem:[%s2767_s28 + $0x60] sm:$0xf] %vm1772_vm4, %v1732_v48  ;;  %v1537_v3 = vmul.f32 %v3096_v18, %v1469_v39 }
 0x17f   : > { %v1224_v56 = vpop.f32.mrf.mxu1  ;;  %v1636_v13 = vadd.f32 %v3105_v45, %v1568_v51  ;;  %1434 = vst.msk [vmem:[#allocation2 + $0x1c8] sm:$0xff] %vm313_vm3, %v1369_v35 }
 0x180   : > { %v1605_v53 = vadd.f32 %v3105_v45, %v1537_v3  ;;  %1403 = vst.msk [vmem:[#allocation2 + $0xd0] sm:$0xff] %vm313_vm3, %v1338_v50  ;;  %v1128_v12 = vpop.f32.mrf.mxu2  ;;  %v1304_v35 = vpop.f32.mrf.mxu3 }
 0x181   : > { %v1700_v59 = vmax.f32 %v1636_v13, 0.0  ;;  %v1298_v61 = vadd.f32 %v1297_v36, %v1128_v12  ;;  %v1050_v63 = vpop.f32.mrf.mxu0  ;;  %v438_v36 = vld [vmem:[#allocation2 + $0x1e0] sm:$0xff] }
 0x182   : > { %v1669_v9 = vmax.f32 %v1605_v53, 0.0  ;;  %v1220_v0 = vadd.f32 %v3178_v17, %v1050_v63  ;;  %v437_v17 = vld [vmem:[#allocation2 + $0x1d8] sm:$0xff] }
 0x183   : > { %v1764_v1 = vpack.c.bf16 %v1700_v59, %v1700_v59  ;;  %v1370_v5 = vadd.f32 %v1298_v61, %v436_v54 }
 0x184   : > { %v1733_v26 = vpack.c.bf16 %v1669_v9, %v1669_v9  ;;  %v1339_v6 = vadd.f32 %v1220_v0, %v405_v46  ;;  %v408_v9 = vld [vmem:[#allocation2 + $0xf0] sm:$0xff] }
 0x185   : > { %1829 = vst.msk [vmem:[%s2767_s28 + $0xe0] sm:$0xf] %vm1772_vm4, %v1764_v1 }
 0x186   : > { %1798 = vst.msk [vmem:[%s2767_s28 + $0x64] sm:$0xf] %vm1772_vm4, %v1733_v26  ;;  %v1501_v11 = vld [vmem:[#allocation2 + $0x1c8] sm:$0xff] }
 0x187   : > { %v3214_v20 = vpop.f32.mrf.mxu1  ;;  %v1569_v55 = vmul.f32 %v3096_v18, %v1501_v11  ;;  %v1470_v37 = vld [vmem:[#allocation2 + $0xd0] sm:$0xff]  ;;  %1435 = vst.msk [vmem:[#allocation2 + $0x1d0] sm:$0xff] %vm313_vm3, %v1370_v5 }
 0x188   : > { %v1538_v8 = vmul.f32 %v3096_v18, %v1470_v37  ;;  %1404 = vst.msk [vmem:[#allocation2 + $0xd8] sm:$0xff] %vm313_vm3, %v1339_v6  ;;  %v1130_v14 = vpop.f32.mrf.mxu2 }
 0x189   : > { %v1637_v62 = vadd.f32 %v3105_v45, %v1569_v55  ;;  %v1300_v15 = vadd.f32 %v1299_v58, %v1130_v14  ;;  %v1053_v19 = vpop.f32.mrf.mxu0  ;;  %v439_v58 = vld [vmem:[#allocation2 + $0x1e8] sm:$0xff]  ;;  %v1307_v14 = vpop.f32.mrf.mxu3 }
 0x18a   : > { %v1606_v21 = vadd.f32 %v3105_v45, %v1538_v8  ;;  %v1223_v60 = vadd.f32 %v1222_v34, %v1053_v19 }
 0x18b   : > { %v1701_v23 = vmax.f32 %v1637_v62, 0.0  ;;  %v1371_v24 = vadd.f32 %v1300_v15, %v437_v17  ;;  %v411_v62 = vld [vmem:[#allocation2 + $0x108] sm:$0xff] }
 0x18c   : > { %v1670_v25 = vmax.f32 %v1606_v21, 0.0  ;;  %v1340_v7 = vadd.f32 %v1223_v60, %v406_v41  ;;  %v440_v21 = vld [vmem:[#allocation2 + $0x1f0] sm:$0xff] }
 0x18d   : > { %v1765_v27 = vpack.c.bf16 %v1701_v23, %v1701_v23  ;;  %1436 = vst.msk [vmem:[#allocation2 + $0x1d8] sm:$0xff] %vm313_vm3, %v1371_v24 }
 0x18e   : > { %v1734_v29 = vpack.c.bf16 %v1670_v25, %v1670_v25  ;;  %v1502_v32 = vld [vmem:[#allocation2 + $0x1d0] sm:$0xff]  ;;  %1405 = vst.msk [vmem:[#allocation2 + $0xe0] sm:$0xff] %vm313_vm3, %v1340_v7  ;;  %v409_v25 = vld [vmem:[#allocation2 + $0xf8] sm:$0xff] }
 0x18f   : > { %v3224_v4 = vpop.f32.mrf.mxu1  ;;  %1830 = vst.msk [vmem:[%s2767_s28 + $0xe4] sm:$0xf] %vm1772_vm4, %v1765_v27  ;;  %v1570_v16 = vmul.f32 %v3096_v18, %v1502_v32  ;;  %v1471_v31 = vld [vmem:[#allocation2 + $0xd8] sm:$0xff] }
 0x190   : > { %1799 = vst.msk [vmem:[%s2767_s28 + $0x68] sm:$0xf] %vm1772_vm4, %v1734_v29  ;;  %v1539_v34 = vmul.f32 %v3096_v18, %v1471_v31  ;;  %v1133_v33 = vpop.f32.mrf.mxu2 }
 0x191   : > { %v1638_v57 = vadd.f32 %v3105_v45, %v1570_v16  ;;  %v1303_v38 = vadd.f32 %v1302_v52, %v1133_v33  ;;  %v1055_v42 = vpop.f32.mrf.mxu0 }
 0x192   : > { %v1607_v22 = vadd.f32 %v3105_v45, %v1539_v34  ;;  %v1225_v30 = vadd.f32 %v1224_v56, %v1055_v42  ;;  %v410_v56 = vld [vmem:[#allocation2 + $0x100] sm:$0xff] }
 0x193   : > { %v1702_v43 = vmax.f32 %v1638_v57, 0.0  ;;  %v1372_v44 = vadd.f32 %v1303_v38, %v438_v36 }
 0x194   : > { %v1671_v2 = vmax.f32 %v1607_v22, 0.0  ;;  %v1503_v47 = vld [vmem:[#allocation2 + $0x1d8] sm:$0xff]  ;;  %v1341_v48 = vadd.f32 %v1225_v30, %v407_v40  ;;  %v1309_v22 = vpop.f32.mrf.mxu3 }
 0x195   : > { %v1766_v49 = vpack.c.bf16 %v1702_v43, %v1702_v43  ;;  %v1571_v50 = vmul.f32 %v3096_v18, %v1503_v47  ;;  %v1472_v51 = vld [vmem:[#allocation2 + $0xe0] sm:$0xff]  ;;  %1437 = vst.msk [vmem:[#allocation2 + $0x1e0] sm:$0xff] %vm313_vm3, %v1372_v44  ;;  %v441_v30 = vld [vmem:[#allocation2 + $0x1f8] sm:$0xff] }
 0x196   : > { %v1735_v39 = vpack.c.bf16 %v1671_v2, %v1671_v2  ;;  %v1540_v3 = vmul.f32 %v3096_v18, %v1472_v51  ;;  %1406 = vst.msk [vmem:[#allocation2 + $0xe8] sm:$0xff] %vm313_vm3, %v1341_v48 }
 0x197   : > { %v1232_v13 = vpop.f32.mrf.mxu1  ;;  %1831 = vst.msk [vmem:[%s2767_s28 + $0xe8] sm:$0xf] %vm1772_vm4, %v1766_v49  ;;  %v1639_v53 = vadd.f32 %v3105_v45, %v1571_v50 }
 0x198   : > { %v1233_v54 = vadd.f32 %v1232_v13, %v2716_v10  ;;  %1800 = vst.msk [vmem:[%s2767_s28 + $0x6c] sm:$0xf] %vm1772_vm4, %v1735_v39  ;;  %v1608_v12 = vadd.f32 %v3105_v45, %v1540_v3  ;;  %v1135_v59 = vpop.f32.mrf.mxu2 }
 0x199   : > { %v1703_v61 = vmax.f32 %v1639_v53, 0.0  ;;  %v1305_v63 = vadd.f32 %v1304_v35, %v1135_v59  ;;  %v1058_v0 = vpop.f32.mrf.mxu0 }
 0x19a   : > { %v1344_v46 = vadd.f32 %v1233_v54, %v410_v56  ;;  %v1672_v1 = vmax.f32 %v1608_v12, 0.0  ;;  %v1228_v5 = vadd.f32 %v3214_v20, %v1058_v0 }
 0x19b   : > { %v1767_v26 = vpack.c.bf16 %v1703_v61, %v1703_v61  ;;  %v1373_v10 = vadd.f32 %v1305_v63, %v439_v58 }
 0x19c   : > { %1409 = vst.msk [vmem:[#allocation2 + $0x100] sm:$0xff] %vm313_vm3, %v1344_v46  ;;  %v1736_v6 = vpack.c.bf16 %v1672_v1, %v1672_v1  ;;  %v1504_v11 = vld [vmem:[#allocation2 + $0x1e0] sm:$0xff]  ;;  %v1342_v55 = vadd.f32 %v1228_v5, %v408_v9 }
 0x19d   : > { %1832 = vst.msk [vmem:[%s2767_s28 + $0xec] sm:$0xf] %vm1772_vm4, %v1767_v26  ;;  %v1572_v37 = vmul.f32 %v3096_v18, %v1504_v11  ;;  %v1473_v8 = vld [vmem:[#allocation2 + $0xe8] sm:$0xff] }
 0x19e   : > { %1801 = vst.msk [vmem:[%s2767_s28 + $0x70] sm:$0xf] %vm1772_vm4, %v1736_v6  ;;  %v1541_v17 = vmul.f32 %v3096_v18, %v1473_v8 }
 0x19f   : > { %v1234_v15 = vpop.f32.mrf.mxu1  ;;  %v1640_v20 = vadd.f32 %v3105_v45, %v1572_v37  ;;  %1438 = vst.msk [vmem:[#allocation2 + $0x1e8] sm:$0xff] %vm313_vm3, %v1373_v10 }
 0x1a0   : > { %v1235_v41 = vadd.f32 %v1234_v15, %v2755_v28  ;;  %v1609_v19 = vadd.f32 %v3105_v45, %v1541_v17  ;;  %1407 = vst.msk [vmem:[#allocation2 + $0xf0] sm:$0xff] %vm313_vm3, %v1342_v55  ;;  %v1138_v52 = vpop.f32.mrf.mxu2 }
 0x1a1   : > { %v1704_v60 = vmax.f32 %v1640_v20, 0.0  ;;  %v1308_v24 = vadd.f32 %v1307_v14, %v1138_v52  ;;  %v1060_v7 = vpop.f32.mrf.mxu0 }
 0x1a2   : > { %v1345_v23 = vadd.f32 %v1235_v41, %v411_v62  ;;  %v1673_v27 = vmax.f32 %v1609_v19, 0.0  ;;  %v1230_v32 = vadd.f32 %v3224_v4, %v1060_v7 }
 0x1a3   : > { %v1476_v29 = vld [vmem:[#allocation2 + $0x100] sm:$0xff]  ;;  %v1768_v16 = vpack.c.bf16 %v1704_v60, %v1704_v60  ;;  %v1374_v31 = vadd.f32 %v1308_v24, %v440_v21 }
 0x1a4   : > { %v1544_v28 = vmul.f32 %v3096_v18, %v1476_v29  ;;  %1410 = vst.msk [vmem:[#allocation2 + $0x108] sm:$0xff] %vm313_vm3, %v1345_v23  ;;  %v1737_v34 = vpack.c.bf16 %v1673_v27, %v1673_v27  ;;  %v1343_v36 = vadd.f32 %v1230_v32, %v409_v25 }
 0x1a5   : > { %1833 = vst.msk [vmem:[%s2767_s28 + $0xf0] sm:$0xf] %vm1772_vm4, %v1768_v16 }
 0x1a6   : > { %v1612_v33 = vadd.f32 %v3105_v45, %v1544_v28  ;;  %1802 = vst.msk [vmem:[%s2767_s28 + $0x74] sm:$0xf] %vm1772_vm4, %v1737_v34  ;;  %v1505_v57 = vld [vmem:[#allocation2 + $0x1e8] sm:$0xff] }
 0x1a7   : > { %v1573_v40 = vmul.f32 %v3096_v18, %v1505_v57  ;;  %v1474_v4 = vld [vmem:[#allocation2 + $0xf0] sm:$0xff]  ;;  %1439 = vst.msk [vmem:[#allocation2 + $0x1f0] sm:$0xff] %vm313_vm3, %v1374_v31 }
 0x1a8   : > { %v1676_v38 = vmax.f32 %v1612_v33, 0.0  ;;  %v1542_v42 = vmul.f32 %v3096_v18, %v1474_v4  ;;  %1408 = vst.msk [vmem:[#allocation2 + $0xf8] sm:$0xff] %vm313_vm3, %v1343_v36  ;;  %v1140_v43 = vpop.f32.mrf.mxu2 }
 0x1a9   : > { %v1641_v2 = vadd.f32 %v3105_v45, %v1573_v40  ;;  %v1310_v47 = vadd.f32 %v1309_v22, %v1140_v43 }
 0x1aa   : > { %v1740_v44 = vpack.c.bf16 %v1676_v38, %v1676_v38  ;;  %v1610_v35 = vadd.f32 %v3105_v45, %v1542_v42 }
 0x1ab   : > { %v1477_v48 = vld [vmem:[#allocation2 + $0x108] sm:$0xff]  ;;  %v1705_v49 = vmax.f32 %v1641_v2, 0.0  ;;  %v1375_v51 = vadd.f32 %v1310_v47, %v441_v30 }
 0x1ac   : > { %1805 = vst.msk [vmem:[%s2767_s28 + $0x80] sm:$0xf] %vm1772_vm4, %v1740_v44  ;;  %v1545_v50 = vmul.f32 %v3096_v18, %v1477_v48  ;;  %v1674_v39 = vmax.f32 %v1610_v35, 0.0 }
 0x1ad   : > { %v1769_v3 = vpack.c.bf16 %v1705_v49, %v1705_v49  ;;  %1440 = vst.msk [vmem:[#allocation2 + $0x1f8] sm:$0xff] %vm313_vm3, %v1375_v51 }
 0x1ae   : > { %v1613_v56 = vadd.f32 %v3105_v45, %v1545_v50  ;;  %v1738_v13 = vpack.c.bf16 %v1674_v39, %v1674_v39  ;;  %v1506_v53 = vld [vmem:[#allocation2 + $0x1f0] sm:$0xff] }
 0x1af   : > { %1834 = vst.msk [vmem:[%s2767_s28 + $0xf4] sm:$0xf] %vm1772_vm4, %v1769_v3  ;;  %v1574_v12 = vmul.f32 %v3096_v18, %v1506_v53  ;;  %v1475_v58 = vld [vmem:[#allocation2 + $0xf8] sm:$0xff] }
 0x1b0   : > { %v1677_v54 = vmax.f32 %v1613_v56, 0.0  ;;  %1803 = vst.msk [vmem:[%s2767_s28 + $0x78] sm:$0xf] %vm1772_vm4, %v1738_v13  ;;  %v1543_v59 = vmul.f32 %v3096_v18, %v1475_v58 }
 0x1b1   : > { %v1642_v46 = vadd.f32 %v3105_v45, %v1574_v12 }
 0x1b2   : > { %v1741_v61 = vpack.c.bf16 %v1677_v54, %v1677_v54  ;;  %v1611_v63 = vadd.f32 %v3105_v45, %v1543_v59 }
 0x1b3   : > { %v1706_v9 = vmax.f32 %v1642_v46, 0.0 }
 0x1b4   : > { %1806 = vst.msk [vmem:[%s2767_s28 + $0x84] sm:$0xf] %vm1772_vm4, %v1741_v61  ;;  %v1675_v0 = vmax.f32 %v1611_v63, 0.0  ;;  %v1507_v1 = vld [vmem:[#allocation2 + $0x1f8] sm:$0xff] }
 0x1b5   : > { %v1770_v5 = vpack.c.bf16 %v1706_v9, %v1706_v9  ;;  %v1575_v26 = vmul.f32 %v3096_v18, %v1507_v1 }
 0x1b6   : > { %v1739_v10 = vpack.c.bf16 %v1675_v0, %v1675_v0 }
 0x1b7   : > { %1835 = vst.msk [vmem:[%s2767_s28 + $0xf8] sm:$0xf] %vm1772_vm4, %v1770_v5  ;;  %v1643_v6 = vadd.f32 %v3105_v45, %v1575_v26 }
 0x1b8   : > { %1804 = vst.msk [vmem:[%s2767_s28 + $0x7c] sm:$0xf] %vm1772_vm4, %v1739_v10 }
 0x1b9   : > { %v1707_v11 = vmax.f32 %v1643_v6, 0.0 }
 0x1bb   : > { %v1771_v55 = vpack.c.bf16 %v1707_v11, %v1707_v11 }
 0x1bd   : > { %1836 = vst.msk [vmem:[%s2767_s28 + $0xfc] sm:$0xf] %vm1772_vm4, %v1771_v55 }
 0x1be PF: > { %s14_s17 = sadd.s32 1, %s2438_s17   ;;  %s3309_s15 = smov %s2434_s16 }
 0x1bf   : > { %p11_p5 = scmp.ge.s32.totalorder %s14_s17, 6   ;;  %s3310_s16 = smov %s3312_s18 }
 0x1c1   :  { %13 = sbr.rel (!%p11_p5) target bundleno = 2 (0x2), region = 83 }

</bundles_post_ra>
